<compile_context>
chip_gen: v7x
topology: tpu7x:2x2x1
jax: 0.10.0
libtpu: 0.0.40
codegen_flags: <defaults>
</compile_context>

<pallas_src>
import jax
import jax.numpy as jnp
import numpy as np
from jax.experimental import pallas as pl
from jax.experimental.pallas import tpu as pltpu

B_TILE = 8  # one full sublane group per batch tile


# ----------------------------------------------------------------------------
# Fused bidirectional-GRU encoder kernel (one program per batch tile)
# ----------------------------------------------------------------------------
def _encoder_fused_kernel(x_ref, mask_ref, w_ih_ref, b_gi_ref, w_hh_ref,
                          b_hn_ref, w_fc_ref, b_fc_ref, out_ref, hid_ref):
    T, Bt, H2 = out_ref.shape          # H2 = 2 * enc_hid_dim
    H = H2 // 2

    # Input-side gate pre-activations for ALL steps of BOTH directions in one
    # matmul: x row-block t is [x(t) | x(T-1-t)] and w_ih is block-diagonal,
    # gate-major (r|z|n, each 2H wide), so gi row-block t is exactly the fused
    # step-t input.  b_gi already contains b_ih (+ b_hh for the r/z gates).
    gi = jnp.dot(x_ref[...], w_ih_ref[...],
                 preferred_element_type=jnp.float32) + b_gi_ref[...]   # [T*Bt, 6H]

    w_hh = w_hh_ref[...]                                  # [2H, 6H] block-diag
    b_hn = jnp.broadcast_to(b_hn_ref[...], (Bt, H2))      # hoisted broadcast

    h = jnp.zeros((Bt, H2), jnp.float32)                  # [h_fwd | h_bwd]

    # Serial recurrence: ONE hidden-side matmul + ONE gate pass per step covers
    # both directions.  T is small -> keep the static unroll.
    # TODO(synk): for large T switch to lax.fori_loop(..., unroll=True) to keep
    # vreg live ranges bounded.
    for t in range(T):
        gi_t = gi[t * Bt:(t + 1) * Bt, :]                 # sublane-aligned slice
        m_t = mask_ref[t]                                 # [Bt, 2H] f32 mask
        gh = jnp.dot(h, w_hh, preferred_element_type=jnp.float32)     # [Bt, 6H]
        r = jax.nn.sigmoid(gi_t[:, 0:H2] + gh[:, 0:H2])
        z = jax.nn.sigmoid(gi_t[:, H2:2 * H2] + gh[:, H2:2 * H2])
        n = jnp.tanh(gi_t[:, 2 * H2:3 * H2] + r * (gh[:, 2 * H2:3 * H2] + b_hn))
        h_new = (1.0 - z) * n + z * h
        h = h + m_t * (h_new - h)          # pack_padded: pads keep prev state
        out_ref[t] = m_t * h               # single fused [Bt, 2H] store / step

    # hidden = tanh([h_fwd | h_bwd] @ W_fc^T + b_fc): single-matmul epilogue.
    hid_ref[...] = jnp.tanh(
        jnp.dot(h, w_fc_ref[...], preferred_element_type=jnp.float32)
        + b_fc_ref[...])


# ----------------------------------------------------------------------------
# Encoder forward (wrapper: gather + layout plumbing + one pallas_call)
# ----------------------------------------------------------------------------
def encoder_forward(packed, src, src_len):
    # src: [T, B] int32 token ids ; src_len: [B] int32 (descending, PyTorch-style)
    T, B = src.shape
    E = packed["embedding"].shape[1]
    H2 = packed["w_hh"].shape[0]
    H = H2 // 2
    D = packed["w_fc"].shape[1]

    n_btiles = -(-B // B_TILE)
    Bp = n_btiles * B_TILE

    # Embedding gather stays in XLA (jnp.take): keeps (potentially huge) vocab
    # tables out of VMEM; dropout = identity (eval mode).
    emb = jnp.take(packed["embedding"], src.astype(jnp.int32), axis=0)   # [T,B,E]
    emb = jnp.pad(emb, ((0, 0), (0, Bp - B), (0, 0)))                    # pad batch
    lens = jnp.pad(src_len.astype(jnp.int32), (0, Bp - B))               # pads -> len 0

    # Fused-direction input stream: row-block t carries [x(t) | x(T-1-t)].
    x_cat = jnp.concatenate([emb, emb[::-1]], axis=-1)                   # [T,Bp,2E]
    x_flat = (x_cat.reshape(T, n_btiles, B_TILE, 2 * E)
              .transpose(1, 0, 2, 3)
              .reshape(n_btiles, T * B_TILE, 2 * E))

    # pack_padded masks for both directions, hoisted fully out of the kernel.
    t_idx = jnp.arange(T)
    mf = (t_idx[:, None] < lens[None, :]).astype(jnp.float32)            # [T,Bp]
    mb = ((T - 1 - t_idx)[:, None] < lens[None, :]).astype(jnp.float32)  # [T,Bp]
    mask = jnp.concatenate(
        [jnp.broadcast_to(mf[:, :, None], (T, Bp, H)),
         jnp.broadcast_to(mb[:, :, None], (T, Bp, H))], axis=-1)         # [T,Bp,2H]

    def full_spec(a):
        return pl.BlockSpec(a.shape, lambda b, _nd=a.ndim: (0,) * _nd)

    out_steps, hidden_p = pl.pallas_call(
        _encoder_fused_kernel,
        out_shape=(jax.ShapeDtypeStruct((T, Bp, H2), jnp.float32),
                   jax.ShapeDtypeStruct((Bp, D), jnp.float32)),
        grid=(n_btiles,),
        in_specs=[
            pl.BlockSpec((None, T * B_TILE, 2 * E), lambda b: (b, 0, 0)),
            pl.BlockSpec((T, B_TILE, H2), lambda b: (0, b, 0)),
            full_spec(packed["w_ih"]), full_spec(packed["b_gi"]),
            full_spec(packed["w_hh"]), full_spec(packed["b_hn"]),
            full_spec(packed["w_fc"]), full_spec(packed["b_fc"]),
        ],
        out_specs=(pl.BlockSpec((T, B_TILE, H2), lambda b: (0, b, 0)),
                   pl.BlockSpec((B_TILE, D), lambda b: (b, 0))),
        compiler_params=pltpu.CompilerParams(
            dimension_semantics=("parallel",)),
    )(x_flat, mask, packed["w_ih"], packed["b_gi"], packed["w_hh"],
      packed["b_hn"], packed["w_fc"], packed["b_fc"])

    # Un-flip the backward half (fused step t produced bwd time T-1-t) and drop
    # the batch padding.
    outputs = jnp.concatenate([out_steps[:, :B, :H],
                               out_steps[::-1, :B, H:]], axis=-1)        # [T,B,2H]
    return outputs, hidden_p[:B]


# ----------------------------------------------------------------------------
# Parameter init (PyTorch-like layout, pre-transposed for x @ W^T) + packing
# into the fused block-diagonal / gate-major kernel layout (done once).
# ----------------------------------------------------------------------------
def init_params(key, input_dim, emb_dim, enc_hid_dim, dec_hid_dim):
    ks = jax.random.split(key, 12)
    H, E, D = enc_hid_dim, emb_dim, dec_hid_dim
    u = lambda k, shape, s: jax.random.uniform(k, shape, jnp.float32, -s, s)
    return {
        "embedding": u(ks[0], (input_dim, E), 0.1),
        # forward direction (weights stored pre-transposed for x @ W^T)
        "w_ih_f_t": u(ks[1], (E, 3 * H), 0.1),
        "w_hh_f_t": u(ks[2], (H, 3 * H), 0.1),
        "b_ih_f": u(ks[3], (1, 3 * H), 0.1),
        "b_hh_f": u(ks[4], (1, 3 * H), 0.1),
        # backward direction
        "w_ih_b_t": u(ks[5], (E, 3 * H), 0.1),
        "w_hh_b_t": u(ks[6], (H, 3 * H), 0.1),
        "b_ih_b": u(ks[7], (1, 3 * H), 0.1),
        "b_hh_b": u(ks[8], (1, 3 * H), 0.1),
        # fc: Linear(2H -> D), stored as W^T [2H, D]
        "w_fc_t": u(ks[9], (2 * H, D), 0.1),
        "b_fc": u(ks[10], (1, D), 0.1),
    }


def pack_params(p):
    H = p["w_hh_f_t"].shape[0]

    def blockdiag_gate_major(wf, wb):
        # wf, wb: [Din, 3H] with columns [r|z|n]  ->  [2*Din, 6H] block-diag,
        # gate-major columns [r_f|r_b | z_f|z_b | n_f|n_b].
        zf = jnp.zeros_like(wf[:, :H])
        zb = jnp.zeros_like(wb[:, :H])
        top = jnp.concatenate([wf[:, 0:H], zf, wf[:, H:2 * H], zf,
                               wf[:, 2 * H:], zf], axis=1)
        bot = jnp.concatenate([zb, wb[:, 0:H], zb, wb[:, H:2 * H],
                               zb, wb[:, 2 * H:]], axis=1)
        return jnp.concatenate([top, bot], axis=0)

    def gate_major_bias(bf, bb):
        return jnp.concatenate([bf[:, 0:H], bb[:, 0:H],
                                bf[:, H:2 * H], bb[:, H:2 * H],
                                bf[:, 2 * H:], bb[:, 2 * H:]], axis=1)

    b_i = gate_major_bias(p["b_ih_f"], p["b_ih_b"])      # [1, 6H]
    b_h = gate_major_bias(p["b_hh_f"], p["b_hh_b"])      # [1, 6H]
    # r/z halves of b_hh always just add -> pre-fold into the input bias; the
    # n-gate b_hh must stay inside the r * (.) term.
    b_gi = jnp.concatenate([b_i[:, :4 * H] + b_h[:, :4 * H], b_i[:, 4 * H:]],
                           axis=1)                        # [1, 6H]
    b_hn = b_h[:, 4 * H:]                                 # [1, 2H]

    return {
        "embedding": p["embedding"],                                     # [V, E]
        "w_ih": blockdiag_gate_major(p["w_ih_f_t"], p["w_ih_b_t"]),      # [2E, 6H]
        "w_hh": blockdiag_gate_major(p["w_hh_f_t"], p["w_hh_b_t"]),      # [2H, 6H]
        "b_gi": b_gi,                                                    # [1, 6H]
        "b_hn": b_hn,                                                    # [1, 2H]
        "w_fc": p["w_fc_t"],                                             # [2H, D]
        "b_fc": p["b_fc"],                                               # [1, D]
    }


# ----------------------------------------------------------------------------
# Pure-JAX reference (lax.scan) for the correctness check
# ----------------------------------------------------------------------------
def _gru_cell_ref(x, h, w_ih_t, w_hh_t, b_ih, b_hh):
    H = h.shape[-1]
    gi = x @ w_ih_t + b_ih
    gh = h @ w_hh_t + b_hh
    r = jax.nn.sigmoid(gi[:, :H] + gh[:, :H])
    z = jax.nn.sigmoid(gi[:, H:2 * H] + gh[:, H:2 * H])
    n = jnp.tanh(gi[:, 2 * H:] + r * gh[:, 2 * H:])
    return (1.0 - z) * n + z * h


def _gru_dir_ref(emb, mask, w_ih_t, w_hh_t, b_ih, b_hh, reverse):
    B = emb.shape[1]
    H = w_hh_t.shape[0]
    xs = (emb[::-1], mask[::-1]) if reverse else (emb, mask)

    def step(h, inp):
        x, m = inp
        h_new = _gru_cell_ref(x, h, w_ih_t, w_hh_t, b_ih, b_hh)
        h = m * h_new + (1.0 - m) * h
        return h, m * h

    h_final, outs = jax.lax.scan(step, jnp.zeros((B, H), jnp.float32), xs)
    if reverse:
        outs = outs[::-1]
    return outs, h_final


def encoder_forward_ref(params, src, src_len):
    emb = jnp.take(params["embedding"], src, axis=0)
    T = emb.shape[0]
    mask = (jnp.arange(T)[:, None] < src_len[None, :]).astype(jnp.float32)[..., None]
    out_f, hid_f = _gru_dir_ref(emb, mask, params["w_ih_f_t"], params["w_hh_f_t"],
                                params["b_ih_f"], params["b_hh_f"], reverse=False)
    out_b, hid_b = _gru_dir_ref(emb, mask, params["w_ih_b_t"], params["w_hh_b_t"],
                                params["b_ih_b"], params["b_hh_b"], reverse=True)
    outputs = jnp.concatenate([out_f, out_b], axis=-1)
    h_cat = jnp.concatenate([hid_f, hid_b], axis=-1)
    hidden = jnp.tanh(h_cat @ params["w_fc_t"] + params["b_fc"])
    return outputs, hidden


# ----------------------------------------------------------------------------
if __name__ == "__main__":
    INPUT_DIM = 50      # vocab size
    EMB_DIM = 32
    ENC_HID_DIM = 32
    DEC_HID_DIM = 32
    T, B = 8, 4

    key = jax.random.PRNGKey(0)
    kp, ks = jax.random.split(key)
    params = init_params(kp, INPUT_DIM, EMB_DIM, ENC_HID_DIM, DEC_HID_DIM)
    packed = pack_params(params)

    src = jax.random.randint(ks, (T, B), 0, INPUT_DIM, dtype=jnp.int32)
    src_len = jnp.array([8, 7, 5, 3], dtype=jnp.int32)   # sorted descending

    enc = jax.jit(encoder_forward)
    outputs, hidden = jax.block_until_ready(enc(packed, src, src_len))
    out_ref, hid_ref = jax.block_until_ready(encoder_forward_ref(params, src, src_len))

    assert outputs.shape == (T, B, 2 * ENC_HID_DIM)
    assert hidden.shape == (B, DEC_HID_DIM)
    np.testing.assert_allclose(np.asarray(outputs), np.asarray(out_ref),
                               rtol=1e-3, atol=2e-3)
    np.testing.assert_allclose(np.asarray(hidden), np.asarray(hid_ref),
                               rtol=1e-3, atol=2e-3)
    print("KERNEL_OK")
</pallas_src>

<mosaic_0001>
module attributes {stable_mosaic.version = 11 : i64} {
  func.func @_encoder_fused_kernel(%arg0: i32, %arg1: memref<1x64x64xf32, #tpu.memory_space<vmem>>, %arg2: memref<8x8x64xf32, #tpu.memory_space<vmem>>, %arg3: memref<64x192xf32, #tpu.memory_space<vmem>>, %arg4: memref<1x192xf32, #tpu.memory_space<vmem>>, %arg5: memref<64x192xf32, #tpu.memory_space<vmem>>, %arg6: memref<1x64xf32, #tpu.memory_space<vmem>>, %arg7: memref<64x32xf32, #tpu.memory_space<vmem>>, %arg8: memref<1x32xf32, #tpu.memory_space<vmem>>, %arg9: memref<8x8x64xf32, #tpu.memory_space<vmem>>, %arg10: memref<8x32xf32, #tpu.memory_space<vmem>>) attributes {dimension_semantics = [#tpu.dimension_semantics<parallel>], iteration_bounds = array<i64: 1>, scalar_prefetch = 0 : i64, scratch_operands = 0 : i64, tpu.core_type = #tpu.core_type<tc>, window_params = [{transform_indices = @transform_0, window_bounds = array<i64: 1, 64, 64>}, {transform_indices = @transform_1, window_bounds = array<i64: 8, 8, 64>}, {pipeline_mode = #tpu.pipeline_mode<synchronous>, transform_indices = @transform_2, window_bounds = array<i64: 64, 192>}, {pipeline_mode = #tpu.pipeline_mode<synchronous>, transform_indices = @transform_3, window_bounds = array<i64: 1, 192>}, {pipeline_mode = #tpu.pipeline_mode<synchronous>, transform_indices = @transform_4, window_bounds = array<i64: 64, 192>}, {pipeline_mode = #tpu.pipeline_mode<synchronous>, transform_indices = @transform_5, window_bounds = array<i64: 1, 64>}, {pipeline_mode = #tpu.pipeline_mode<synchronous>, transform_indices = @transform_6, window_bounds = array<i64: 64, 32>}, {pipeline_mode = #tpu.pipeline_mode<synchronous>, transform_indices = @transform_7, window_bounds = array<i64: 1, 32>}, {transform_indices = @transform_8, window_bounds = array<i64: 8, 8, 64>}, {transform_indices = @transform_9, window_bounds = array<i64: 8, 32>}]} {
    %c0 = arith.constant 0 : index
    %c0_0 = arith.constant 0 : index
    %c0_1 = arith.constant 0 : index
    %0 = vector.load %arg1[%c0, %c0_0, %c0_1] : memref<1x64x64xf32, #tpu.memory_space<vmem>>, vector<1x64x64xf32>
    %1 = vector.shape_cast %0 : vector<1x64x64xf32> to vector<64x64xf32>
    %c0_2 = arith.constant 0 : index
    %c0_3 = arith.constant 0 : index
    %2 = vector.load %arg3[%c0_2, %c0_3] : memref<64x192xf32, #tpu.memory_space<vmem>>, vector<64x192xf32>
    %cst = arith.constant dense<0.000000e+00> : vector<64x192xf32>
    %3 = tpu.matmul %1, %2, %cst {dimension_numbers = #tpu.dot_dimension_numbers<[1], [0], [0], [1], [0, 0, 1, 1], [], []>} : vector<64x64xf32>, vector<64x192xf32>, vector<64x192xf32> -> vector<64x192xf32>
    %c0_4 = arith.constant 0 : index
    %c0_5 = arith.constant 0 : index
    %4 = vector.load %arg4[%c0_4, %c0_5] : memref<1x192xf32, #tpu.memory_space<vmem>>, vector<1x192xf32>
    %5 = vector.broadcast %4 : vector<1x192xf32> to vector<64x192xf32>
    %6 = arith.addf %3, %5 : vector<64x192xf32>
    %c0_6 = arith.constant 0 : index
    %c0_7 = arith.constant 0 : index
    %7 = vector.load %arg5[%c0_6, %c0_7] : memref<64x192xf32, #tpu.memory_space<vmem>>, vector<64x192xf32>
    %c0_8 = arith.constant 0 : index
    %c0_9 = arith.constant 0 : index
    %8 = vector.load %arg6[%c0_8, %c0_9] : memref<1x64xf32, #tpu.memory_space<vmem>>, vector<1x64xf32>
    %9 = vector.shape_cast %8 : vector<1x64xf32> to vector<1x64xf32>
    %10 = vector.broadcast %9 : vector<1x64xf32> to vector<8x64xf32>
    %cst_10 = arith.constant 0.000000e+00 : f32
    %11 = vector.broadcast %cst_10 : f32 to vector<8x64xf32>
    %12 = vector.extract_strided_slice %6 {offsets = [0, 0], sizes = [8, 192], strides = [1, 1]} : vector<64x192xf32> to vector<8x192xf32>
    %c0_11 = arith.constant 0 : index
    %c0_12 = arith.constant 0 : index
    %c0_13 = arith.constant 0 : index
    %13 = vector.load %arg2[%c0_11, %c0_12, %c0_13] : memref<8x8x64xf32, #tpu.memory_space<vmem>>, vector<1x8x64xf32>
    %14 = vector.shape_cast %13 : vector<1x8x64xf32> to vector<8x64xf32>
    %cst_14 = arith.constant dense<0.000000e+00> : vector<8x192xf32>
    %15 = tpu.matmul %11, %7, %cst_14 {dimension_numbers = #tpu.dot_dimension_numbers<[1], [0], [0], [1], [0, 0, 1, 1], [], []>} : vector<8x64xf32>, vector<64x192xf32>, vector<8x192xf32> -> vector<8x192xf32>
    %16 = vector.extract_strided_slice %12 {offsets = [0, 0], sizes = [8, 64], strides = [1, 1]} : vector<8x192xf32> to vector<8x64xf32>
    %17 = vector.extract_strided_slice %15 {offsets = [0, 0], sizes = [8, 64], strides = [1, 1]} : vector<8x192xf32> to vector<8x64xf32>
    %18 = arith.addf %16, %17 : vector<8x64xf32>
    %19 = arith.negf %18 : vector<8x64xf32>
    %20 = math.exp %19 : vector<8x64xf32>
    %cst_15 = arith.constant 1.000000e+00 : f32
    %21 = vector.broadcast %cst_15 : f32 to vector<8x64xf32>
    %22 = arith.addf %21, %20 : vector<8x64xf32>
    %23 = arith.divf %21, %22 : vector<8x64xf32>
    %24 = vector.extract_strided_slice %12 {offsets = [0, 64], sizes = [8, 64], strides = [1, 1]} : vector<8x192xf32> to vector<8x64xf32>
    %25 = vector.extract_strided_slice %15 {offsets = [0, 64], sizes = [8, 64], strides = [1, 1]} : vector<8x192xf32> to vector<8x64xf32>
    %26 = arith.addf %24, %25 : vector<8x64xf32>
    %27 = arith.negf %26 : vector<8x64xf32>
    %28 = math.exp %27 : vector<8x64xf32>
    %cst_16 = arith.constant 1.000000e+00 : f32
    %29 = vector.broadcast %cst_16 : f32 to vector<8x64xf32>
    %30 = arith.addf %29, %28 : vector<8x64xf32>
    %31 = arith.divf %29, %30 : vector<8x64xf32>
    %32 = vector.extract_strided_slice %12 {offsets = [0, 128], sizes = [8, 64], strides = [1, 1]} : vector<8x192xf32> to vector<8x64xf32>
    %33 = vector.extract_strided_slice %15 {offsets = [0, 128], sizes = [8, 64], strides = [1, 1]} : vector<8x192xf32> to vector<8x64xf32>
    %34 = arith.addf %33, %10 : vector<8x64xf32>
    %35 = arith.mulf %23, %34 : vector<8x64xf32>
    %36 = arith.addf %32, %35 : vector<8x64xf32>
    %37 = math.tanh %36 : vector<8x64xf32>
    %cst_17 = arith.constant 1.000000e+00 : f32
    %38 = vector.broadcast %cst_17 : f32 to vector<8x64xf32>
    %39 = arith.subf %38, %31 : vector<8x64xf32>
    %40 = arith.mulf %39, %37 : vector<8x64xf32>
    %41 = arith.mulf %31, %11 : vector<8x64xf32>
    %42 = arith.addf %40, %41 : vector<8x64xf32>
    %43 = arith.subf %42, %11 : vector<8x64xf32>
    %44 = arith.mulf %14, %43 : vector<8x64xf32>
    %45 = arith.addf %11, %44 : vector<8x64xf32>
    %46 = arith.mulf %14, %45 : vector<8x64xf32>
    %c0_18 = arith.constant 0 : index
    %c0_19 = arith.constant 0 : index
    %c0_20 = arith.constant 0 : index
    %47 = vector.load %arg9[%c0_18, %c0_19, %c0_20] : memref<8x8x64xf32, #tpu.memory_space<vmem>>, vector<1x8x64xf32>
    %48 = vector.shape_cast %47 : vector<1x8x64xf32> to vector<8x64xf32>
    %49 = vector.shape_cast %46 : vector<8x64xf32> to vector<1x8x64xf32>
    tpu.vector_store %arg9[%c0_18, %c0_19, %c0_20], %49 {strides = array<i32>} : memref<8x8x64xf32, #tpu.memory_space<vmem>>, vector<1x8x64xf32>,
    %50 = vector.extract_strided_slice %6 {offsets = [8, 0], sizes = [8, 192], strides = [1, 1]} : vector<64x192xf32> to vector<8x192xf32>
    %c1 = arith.constant 1 : index
    %c0_21 = arith.constant 0 : index
    %c0_22 = arith.constant 0 : index
    %51 = vector.load %arg2[%c1, %c0_21, %c0_22] : memref<8x8x64xf32, #tpu.memory_space<vmem>>, vector<1x8x64xf32>
    %52 = vector.shape_cast %51 : vector<1x8x64xf32> to vector<8x64xf32>
    %cst_23 = arith.constant dense<0.000000e+00> : vector<8x192xf32>
    %53 = tpu.matmul %45, %7, %cst_23 {dimension_numbers = #tpu.dot_dimension_numbers<[1], [0], [0], [1], [0, 0, 1, 1], [], []>} : vector<8x64xf32>, vector<64x192xf32>, vector<8x192xf32> -> vector<8x192xf32>
    %54 = vector.extract_strided_slice %50 {offsets = [0, 0], sizes = [8, 64], strides = [1, 1]} : vector<8x192xf32> to vector<8x64xf32>
    %55 = vector.extract_strided_slice %53 {offsets = [0, 0], sizes = [8, 64], strides = [1, 1]} : vector<8x192xf32> to vector<8x64xf32>
    %56 = arith.addf %54, %55 : vector<8x64xf32>
    %57 = arith.negf %56 : vector<8x64xf32>
    %58 = math.exp %57 : vector<8x64xf32>
    %cst_24 = arith.constant 1.000000e+00 : f32
    %59 = vector.broadcast %cst_24 : f32 to vector<8x64xf32>
    %60 = arith.addf %59, %58 : vector<8x64xf32>
    %61 = arith.divf %59, %60 : vector<8x64xf32>
    %62 = vector.extract_strided_slice %50 {offsets = [0, 64], sizes = [8, 64], strides = [1, 1]} : vector<8x192xf32> to vector<8x64xf32>
    %63 = vector.extract_strided_slice %53 {offsets = [0, 64], sizes = [8, 64], strides = [1, 1]} : vector<8x192xf32> to vector<8x64xf32>
    %64 = arith.addf %62, %63 : vector<8x64xf32>
    %65 = arith.negf %64 : vector<8x64xf32>
    %66 = math.exp %65 : vector<8x64xf32>
    %cst_25 = arith.constant 1.000000e+00 : f32
    %67 = vector.broadcast %cst_25 : f32 to vector<8x64xf32>
    %68 = arith.addf %67, %66 : vector<8x64xf32>
    %69 = arith.divf %67, %68 : vector<8x64xf32>
    %70 = vector.extract_strided_slice %50 {offsets = [0, 128], sizes = [8, 64], strides = [1, 1]} : vector<8x192xf32> to vector<8x64xf32>
    %71 = vector.extract_strided_slice %53 {offsets = [0, 128], sizes = [8, 64], strides = [1, 1]} : vector<8x192xf32> to vector<8x64xf32>
    %72 = arith.addf %71, %10 : vector<8x64xf32>
    %73 = arith.mulf %61, %72 : vector<8x64xf32>
    %74 = arith.addf %70, %73 : vector<8x64xf32>
    %75 = math.tanh %74 : vector<8x64xf32>
    %cst_26 = arith.constant 1.000000e+00 : f32
    %76 = vector.broadcast %cst_26 : f32 to vector<8x64xf32>
    %77 = arith.subf %76, %69 : vector<8x64xf32>
    %78 = arith.mulf %77, %75 : vector<8x64xf32>
    %79 = arith.mulf %69, %45 : vector<8x64xf32>
    %80 = arith.addf %78, %79 : vector<8x64xf32>
    %81 = arith.subf %80, %45 : vector<8x64xf32>
    %82 = arith.mulf %52, %81 : vector<8x64xf32>
    %83 = arith.addf %45, %82 : vector<8x64xf32>
    %84 = arith.mulf %52, %83 : vector<8x64xf32>
    %c1_27 = arith.constant 1 : index
    %c0_28 = arith.constant 0 : index
    %c0_29 = arith.constant 0 : index
    %85 = vector.load %arg9[%c1_27, %c0_28, %c0_29] : memref<8x8x64xf32, #tpu.memory_space<vmem>>, vector<1x8x64xf32>
    %86 = vector.shape_cast %85 : vector<1x8x64xf32> to vector<8x64xf32>
    %87 = vector.shape_cast %84 : vector<8x64xf32> to vector<1x8x64xf32>
    tpu.vector_store %arg9[%c1_27, %c0_28, %c0_29], %87 {strides = array<i32>} : memref<8x8x64xf32, #tpu.memory_space<vmem>>, vector<1x8x64xf32>,
    %88 = vector.extract_strided_slice %6 {offsets = [16, 0], sizes = [8, 192], strides = [1, 1]} : vector<64x192xf32> to vector<8x192xf32>
    %c2 = arith.constant 2 : index
    %c0_30 = arith.constant 0 : index
    %c0_31 = arith.constant 0 : index
    %89 = vector.load %arg2[%c2, %c0_30, %c0_31] : memref<8x8x64xf32, #tpu.memory_space<vmem>>, vector<1x8x64xf32>
    %90 = vector.shape_cast %89 : vector<1x8x64xf32> to vector<8x64xf32>
    %cst_32 = arith.constant dense<0.000000e+00> : vector<8x192xf32>
    %91 = tpu.matmul %83, %7, %cst_32 {dimension_numbers = #tpu.dot_dimension_numbers<[1], [0], [0], [1], [0, 0, 1, 1], [], []>} : vector<8x64xf32>, vector<64x192xf32>, vector<8x192xf32> -> vector<8x192xf32>
    %92 = vector.extract_strided_slice %88 {offsets = [0, 0], sizes = [8, 64], strides = [1, 1]} : vector<8x192xf32> to vector<8x64xf32>
    %93 = vector.extract_strided_slice %91 {offsets = [0, 0], sizes = [8, 64], strides = [1, 1]} : vector<8x192xf32> to vector<8x64xf32>
    %94 = arith.addf %92, %93 : vector<8x64xf32>
    %95 = arith.negf %94 : vector<8x64xf32>
    %96 = math.exp %95 : vector<8x64xf32>
    %cst_33 = arith.constant 1.000000e+00 : f32
    %97 = vector.broadcast %cst_33 : f32 to vector<8x64xf32>
    %98 = arith.addf %97, %96 : vector<8x64xf32>
    %99 = arith.divf %97, %98 : vector<8x64xf32>
    %100 = vector.extract_strided_slice %88 {offsets = [0, 64], sizes = [8, 64], strides = [1, 1]} : vector<8x192xf32> to vector<8x64xf32>
    %101 = vector.extract_strided_slice %91 {offsets = [0, 64], sizes = [8, 64], strides = [1, 1]} : vector<8x192xf32> to vector<8x64xf32>
    %102 = arith.addf %100, %101 : vector<8x64xf32>
    %103 = arith.negf %102 : vector<8x64xf32>
    %104 = math.exp %103 : vector<8x64xf32>
    %cst_34 = arith.constant 1.000000e+00 : f32
    %105 = vector.broadcast %cst_34 : f32 to vector<8x64xf32>
    %106 = arith.addf %105, %104 : vector<8x64xf32>
    %107 = arith.divf %105, %106 : vector<8x64xf32>
    %108 = vector.extract_strided_slice %88 {offsets = [0, 128], sizes = [8, 64], strides = [1, 1]} : vector<8x192xf32> to vector<8x64xf32>
    %109 = vector.extract_strided_slice %91 {offsets = [0, 128], sizes = [8, 64], strides = [1, 1]} : vector<8x192xf32> to vector<8x64xf32>
    %110 = arith.addf %109, %10 : vector<8x64xf32>
    %111 = arith.mulf %99, %110 : vector<8x64xf32>
    %112 = arith.addf %108, %111 : vector<8x64xf32>
    %113 = math.tanh %112 : vector<8x64xf32>
    %cst_35 = arith.constant 1.000000e+00 : f32
    %114 = vector.broadcast %cst_35 : f32 to vector<8x64xf32>
    %115 = arith.subf %114, %107 : vector<8x64xf32>
    %116 = arith.mulf %115, %113 : vector<8x64xf32>
    %117 = arith.mulf %107, %83 : vector<8x64xf32>
    %118 = arith.addf %116, %117 : vector<8x64xf32>
    %119 = arith.subf %118, %83 : vector<8x64xf32>
    %120 = arith.mulf %90, %119 : vector<8x64xf32>
    %121 = arith.addf %83, %120 : vector<8x64xf32>
    %122 = arith.mulf %90, %121 : vector<8x64xf32>
    %c2_36 = arith.constant 2 : index
    %c0_37 = arith.constant 0 : index
    %c0_38 = arith.constant 0 : index
    %123 = vector.load %arg9[%c2_36, %c0_37, %c0_38] : memref<8x8x64xf32, #tpu.memory_space<vmem>>, vector<1x8x64xf32>
    %124 = vector.shape_cast %123 : vector<1x8x64xf32> to vector<8x64xf32>
    %125 = vector.shape_cast %122 : vector<8x64xf32> to vector<1x8x64xf32>
    tpu.vector_store %arg9[%c2_36, %c0_37, %c0_38], %125 {strides = array<i32>} : memref<8x8x64xf32, #tpu.memory_space<vmem>>, vector<1x8x64xf32>,
    %126 = vector.extract_strided_slice %6 {offsets = [24, 0], sizes = [8, 192], strides = [1, 1]} : vector<64x192xf32> to vector<8x192xf32>
    %c3 = arith.constant 3 : index
    %c0_39 = arith.constant 0 : index
    %c0_40 = arith.constant 0 : index
    %127 = vector.load %arg2[%c3, %c0_39, %c0_40] : memref<8x8x64xf32, #tpu.memory_space<vmem>>, vector<1x8x64xf32>
    %128 = vector.shape_cast %127 : vector<1x8x64xf32> to vector<8x64xf32>
    %cst_41 = arith.constant dense<0.000000e+00> : vector<8x192xf32>
    %129 = tpu.matmul %121, %7, %cst_41 {dimension_numbers = #tpu.dot_dimension_numbers<[1], [0], [0], [1], [0, 0, 1, 1], [], []>} : vector<8x64xf32>, vector<64x192xf32>, vector<8x192xf32> -> vector<8x192xf32>
    %130 = vector.extract_strided_slice %126 {offsets = [0, 0], sizes = [8, 64], strides = [1, 1]} : vector<8x192xf32> to vector<8x64xf32>
    %131 = vector.extract_strided_slice %129 {offsets = [0, 0], sizes = [8, 64], strides = [1, 1]} : vector<8x192xf32> to vector<8x64xf32>
    %132 = arith.addf %130, %131 : vector<8x64xf32>
    %133 = arith.negf %132 : vector<8x64xf32>
    %134 = math.exp %133 : vector<8x64xf32>
    %cst_42 = arith.constant 1.000000e+00 : f32
    %135 = vector.broadcast %cst_42 : f32 to vector<8x64xf32>
    %136 = arith.addf %135, %134 : vector<8x64xf32>
    %137 = arith.divf %135, %136 : vector<8x64xf32>
    %138 = vector.extract_strided_slice %126 {offsets = [0, 64], sizes = [8, 64], strides = [1, 1]} : vector<8x192xf32> to vector<8x64xf32>
    %139 = vector.extract_strided_slice %129 {offsets = [0, 64], sizes = [8, 64], strides = [1, 1]} : vector<8x192xf32> to vector<8x64xf32>
    %140 = arith.addf %138, %139 : vector<8x64xf32>
    %141 = arith.negf %140 : vector<8x64xf32>
    %142 = math.exp %141 : vector<8x64xf32>
    %cst_43 = arith.constant 1.000000e+00 : f32
    %143 = vector.broadcast %cst_43 : f32 to vector<8x64xf32>
    %144 = arith.addf %143, %142 : vector<8x64xf32>
    %145 = arith.divf %143, %144 : vector<8x64xf32>
    %146 = vector.extract_strided_slice %126 {offsets = [0, 128], sizes = [8, 64], strides = [1, 1]} : vector<8x192xf32> to vector<8x64xf32>
    %147 = vector.extract_strided_slice %129 {offsets = [0, 128], sizes = [8, 64], strides = [1, 1]} : vector<8x192xf32> to vector<8x64xf32>
    %148 = arith.addf %147, %10 : vector<8x64xf32>
    %149 = arith.mulf %137, %148 : vector<8x64xf32>
    %150 = arith.addf %146, %149 : vector<8x64xf32>
    %151 = math.tanh %150 : vector<8x64xf32>
    %cst_44 = arith.constant 1.000000e+00 : f32
    %152 = vector.broadcast %cst_44 : f32 to vector<8x64xf32>
    %153 = arith.subf %152, %145 : vector<8x64xf32>
    %154 = arith.mulf %153, %151 : vector<8x64xf32>
    %155 = arith.mulf %145, %121 : vector<8x64xf32>
    %156 = arith.addf %154, %155 : vector<8x64xf32>
    %157 = arith.subf %156, %121 : vector<8x64xf32>
    %158 = arith.mulf %128, %157 : vector<8x64xf32>
    %159 = arith.addf %121, %158 : vector<8x64xf32>
    %160 = arith.mulf %128, %159 : vector<8x64xf32>
    %c3_45 = arith.constant 3 : index
    %c0_46 = arith.constant 0 : index
    %c0_47 = arith.constant 0 : index
    %161 = vector.load %arg9[%c3_45, %c0_46, %c0_47] : memref<8x8x64xf32, #tpu.memory_space<vmem>>, vector<1x8x64xf32>
    %162 = vector.shape_cast %161 : vector<1x8x64xf32> to vector<8x64xf32>
    %163 = vector.shape_cast %160 : vector<8x64xf32> to vector<1x8x64xf32>
    tpu.vector_store %arg9[%c3_45, %c0_46, %c0_47], %163 {strides = array<i32>} : memref<8x8x64xf32, #tpu.memory_space<vmem>>, vector<1x8x64xf32>,
    %164 = vector.extract_strided_slice %6 {offsets = [32, 0], sizes = [8, 192], strides = [1, 1]} : vector<64x192xf32> to vector<8x192xf32>
    %c4 = arith.constant 4 : index
    %c0_48 = arith.constant 0 : index
    %c0_49 = arith.constant 0 : index
    %165 = vector.load %arg2[%c4, %c0_48, %c0_49] : memref<8x8x64xf32, #tpu.memory_space<vmem>>, vector<1x8x64xf32>
    %166 = vector.shape_cast %165 : vector<1x8x64xf32> to vector<8x64xf32>
    %cst_50 = arith.constant dense<0.000000e+00> : vector<8x192xf32>
    %167 = tpu.matmul %159, %7, %cst_50 {dimension_numbers = #tpu.dot_dimension_numbers<[1], [0], [0], [1], [0, 0, 1, 1], [], []>} : vector<8x64xf32>, vector<64x192xf32>, vector<8x192xf32> -> vector<8x192xf32>
    %168 = vector.extract_strided_slice %164 {offsets = [0, 0], sizes = [8, 64], strides = [1, 1]} : vector<8x192xf32> to vector<8x64xf32>
    %169 = vector.extract_strided_slice %167 {offsets = [0, 0], sizes = [8, 64], strides = [1, 1]} : vector<8x192xf32> to vector<8x64xf32>
    %170 = arith.addf %168, %169 : vector<8x64xf32>
    %171 = arith.negf %170 : vector<8x64xf32>
    %172 = math.exp %171 : vector<8x64xf32>
    %cst_51 = arith.constant 1.000000e+00 : f32
    %173 = vector.broadcast %cst_51 : f32 to vector<8x64xf32>
    %174 = arith.addf %173, %172 : vector<8x64xf32>
    %175 = arith.divf %173, %174 : vector<8x64xf32>
    %176 = vector.extract_strided_slice %164 {offsets = [0, 64], sizes = [8, 64], strides = [1, 1]} : vector<8x192xf32> to vector<8x64xf32>
    %177 = vector.extract_strided_slice %167 {offsets = [0, 64], sizes = [8, 64], strides = [1, 1]} : vector<8x192xf32> to vector<8x64xf32>
    %178 = arith.addf %176, %177 : vector<8x64xf32>
    %179 = arith.negf %178 : vector<8x64xf32>
    %180 = math.exp %179 : vector<8x64xf32>
    %cst_52 = arith.constant 1.000000e+00 : f32
    %181 = vector.broadcast %cst_52 : f32 to vector<8x64xf32>
    %182 = arith.addf %181, %180 : vector<8x64xf32>
    %183 = arith.divf %181, %182 : vector<8x64xf32>
    %184 = vector.extract_strided_slice %164 {offsets = [0, 128], sizes = [8, 64], strides = [1, 1]} : vector<8x192xf32> to vector<8x64xf32>
    %185 = vector.extract_strided_slice %167 {offsets = [0, 128], sizes = [8, 64], strides = [1, 1]} : vector<8x192xf32> to vector<8x64xf32>
    %186 = arith.addf %185, %10 : vector<8x64xf32>
    %187 = arith.mulf %175, %186 : vector<8x64xf32>
    %188 = arith.addf %184, %187 : vector<8x64xf32>
    %189 = math.tanh %188 : vector<8x64xf32>
    %cst_53 = arith.constant 1.000000e+00 : f32
    %190 = vector.broadcast %cst_53 : f32 to vector<8x64xf32>
    %191 = arith.subf %190, %183 : vector<8x64xf32>
    %192 = arith.mulf %191, %189 : vector<8x64xf32>
    %193 = arith.mulf %183, %159 : vector<8x64xf32>
    %194 = arith.addf %192, %193 : vector<8x64xf32>
    %195 = arith.subf %194, %159 : vector<8x64xf32>
    %196 = arith.mulf %166, %195 : vector<8x64xf32>
    %197 = arith.addf %159, %196 : vector<8x64xf32>
    %198 = arith.mulf %166, %197 : vector<8x64xf32>
    %c4_54 = arith.constant 4 : index
    %c0_55 = arith.constant 0 : index
    %c0_56 = arith.constant 0 : index
    %199 = vector.load %arg9[%c4_54, %c0_55, %c0_56] : memref<8x8x64xf32, #tpu.memory_space<vmem>>, vector<1x8x64xf32>
    %200 = vector.shape_cast %199 : vector<1x8x64xf32> to vector<8x64xf32>
    %201 = vector.shape_cast %198 : vector<8x64xf32> to vector<1x8x64xf32>
    tpu.vector_store %arg9[%c4_54, %c0_55, %c0_56], %201 {strides = array<i32>} : memref<8x8x64xf32, #tpu.memory_space<vmem>>, vector<1x8x64xf32>,
    %202 = vector.extract_strided_slice %6 {offsets = [40, 0], sizes = [8, 192], strides = [1, 1]} : vector<64x192xf32> to vector<8x192xf32>
    %c5 = arith.constant 5 : index
    %c0_57 = arith.constant 0 : index
    %c0_58 = arith.constant 0 : index
    %203 = vector.load %arg2[%c5, %c0_57, %c0_58] : memref<8x8x64xf32, #tpu.memory_space<vmem>>, vector<1x8x64xf32>
    %204 = vector.shape_cast %203 : vector<1x8x64xf32> to vector<8x64xf32>
    %cst_59 = arith.constant dense<0.000000e+00> : vector<8x192xf32>
    %205 = tpu.matmul %197, %7, %cst_59 {dimension_numbers = #tpu.dot_dimension_numbers<[1], [0], [0], [1], [0, 0, 1, 1], [], []>} : vector<8x64xf32>, vector<64x192xf32>, vector<8x192xf32> -> vector<8x192xf32>
    %206 = vector.extract_strided_slice %202 {offsets = [0, 0], sizes = [8, 64], strides = [1, 1]} : vector<8x192xf32> to vector<8x64xf32>
    %207 = vector.extract_strided_slice %205 {offsets = [0, 0], sizes = [8, 64], strides = [1, 1]} : vector<8x192xf32> to vector<8x64xf32>
    %208 = arith.addf %206, %207 : vector<8x64xf32>
    %209 = arith.negf %208 : vector<8x64xf32>
    %210 = math.exp %209 : vector<8x64xf32>
    %cst_60 = arith.constant 1.000000e+00 : f32
    %211 = vector.broadcast %cst_60 : f32 to vector<8x64xf32>
    %212 = arith.addf %211, %210 : vector<8x64xf32>
    %213 = arith.divf %211, %212 : vector<8x64xf32>
    %214 = vector.extract_strided_slice %202 {offsets = [0, 64], sizes = [8, 64], strides = [1, 1]} : vector<8x192xf32> to vector<8x64xf32>
    %215 = vector.extract_strided_slice %205 {offsets = [0, 64], sizes = [8, 64], strides = [1, 1]} : vector<8x192xf32> to vector<8x64xf32>
    %216 = arith.addf %214, %215 : vector<8x64xf32>
    %217 = arith.negf %216 : vector<8x64xf32>
    %218 = math.exp %217 : vector<8x64xf32>
    %cst_61 = arith.constant 1.000000e+00 : f32
    %219 = vector.broadcast %cst_61 : f32 to vector<8x64xf32>
    %220 = arith.addf %219, %218 : vector<8x64xf32>
    %221 = arith.divf %219, %220 : vector<8x64xf32>
    %222 = vector.extract_strided_slice %202 {offsets = [0, 128], sizes = [8, 64], strides = [1, 1]} : vector<8x192xf32> to vector<8x64xf32>
    %223 = vector.extract_strided_slice %205 {offsets = [0, 128], sizes = [8, 64], strides = [1, 1]} : vector<8x192xf32> to vector<8x64xf32>
    %224 = arith.addf %223, %10 : vector<8x64xf32>
    %225 = arith.mulf %213, %224 : vector<8x64xf32>
    %226 = arith.addf %222, %225 : vector<8x64xf32>
    %227 = math.tanh %226 : vector<8x64xf32>
    %cst_62 = arith.constant 1.000000e+00 : f32
    %228 = vector.broadcast %cst_62 : f32 to vector<8x64xf32>
    %229 = arith.subf %228, %221 : vector<8x64xf32>
    %230 = arith.mulf %229, %227 : vector<8x64xf32>
    %231 = arith.mulf %221, %197 : vector<8x64xf32>
    %232 = arith.addf %230, %231 : vector<8x64xf32>
    %233 = arith.subf %232, %197 : vector<8x64xf32>
    %234 = arith.mulf %204, %233 : vector<8x64xf32>
    %235 = arith.addf %197, %234 : vector<8x64xf32>
    %236 = arith.mulf %204, %235 : vector<8x64xf32>
    %c5_63 = arith.constant 5 : index
    %c0_64 = arith.constant 0 : index
    %c0_65 = arith.constant 0 : index
    %237 = vector.load %arg9[%c5_63, %c0_64, %c0_65] : memref<8x8x64xf32, #tpu.memory_space<vmem>>, vector<1x8x64xf32>
    %238 = vector.shape_cast %237 : vector<1x8x64xf32> to vector<8x64xf32>
    %239 = vector.shape_cast %236 : vector<8x64xf32> to vector<1x8x64xf32>
    tpu.vector_store %arg9[%c5_63, %c0_64, %c0_65], %239 {strides = array<i32>} : memref<8x8x64xf32, #tpu.memory_space<vmem>>, vector<1x8x64xf32>,
    %240 = vector.extract_strided_slice %6 {offsets = [48, 0], sizes = [8, 192], strides = [1, 1]} : vector<64x192xf32> to vector<8x192xf32>
    %c6 = arith.constant 6 : index
    %c0_66 = arith.constant 0 : index
    %c0_67 = arith.constant 0 : index
    %241 = vector.load %arg2[%c6, %c0_66, %c0_67] : memref<8x8x64xf32, #tpu.memory_space<vmem>>, vector<1x8x64xf32>
    %242 = vector.shape_cast %241 : vector<1x8x64xf32> to vector<8x64xf32>
    %cst_68 = arith.constant dense<0.000000e+00> : vector<8x192xf32>
    %243 = tpu.matmul %235, %7, %cst_68 {dimension_numbers = #tpu.dot_dimension_numbers<[1], [0], [0], [1], [0, 0, 1, 1], [], []>} : vector<8x64xf32>, vector<64x192xf32>, vector<8x192xf32> -> vector<8x192xf32>
    %244 = vector.extract_strided_slice %240 {offsets = [0, 0], sizes = [8, 64], strides = [1, 1]} : vector<8x192xf32> to vector<8x64xf32>
    %245 = vector.extract_strided_slice %243 {offsets = [0, 0], sizes = [8, 64], strides = [1, 1]} : vector<8x192xf32> to vector<8x64xf32>
    %246 = arith.addf %244, %245 : vector<8x64xf32>
    %247 = arith.negf %246 : vector<8x64xf32>
    %248 = math.exp %247 : vector<8x64xf32>
    %cst_69 = arith.constant 1.000000e+00 : f32
    %249 = vector.broadcast %cst_69 : f32 to vector<8x64xf32>
    %250 = arith.addf %249, %248 : vector<8x64xf32>
    %251 = arith.divf %249, %250 : vector<8x64xf32>
    %252 = vector.extract_strided_slice %240 {offsets = [0, 64], sizes = [8, 64], strides = [1, 1]} : vector<8x192xf32> to vector<8x64xf32>
    %253 = vector.extract_strided_slice %243 {offsets = [0, 64], sizes = [8, 64], strides = [1, 1]} : vector<8x192xf32> to vector<8x64xf32>
    %254 = arith.addf %252, %253 : vector<8x64xf32>
    %255 = arith.negf %254 : vector<8x64xf32>
    %256 = math.exp %255 : vector<8x64xf32>
    %cst_70 = arith.constant 1.000000e+00 : f32
    %257 = vector.broadcast %cst_70 : f32 to vector<8x64xf32>
    %258 = arith.addf %257, %256 : vector<8x64xf32>
    %259 = arith.divf %257, %258 : vector<8x64xf32>
    %260 = vector.extract_strided_slice %240 {offsets = [0, 128], sizes = [8, 64], strides = [1, 1]} : vector<8x192xf32> to vector<8x64xf32>
    %261 = vector.extract_strided_slice %243 {offsets = [0, 128], sizes = [8, 64], strides = [1, 1]} : vector<8x192xf32> to vector<8x64xf32>
    %262 = arith.addf %261, %10 : vector<8x64xf32>
    %263 = arith.mulf %251, %262 : vector<8x64xf32>
    %264 = arith.addf %260, %263 : vector<8x64xf32>
    %265 = math.tanh %264 : vector<8x64xf32>
    %cst_71 = arith.constant 1.000000e+00 : f32
    %266 = vector.broadcast %cst_71 : f32 to vector<8x64xf32>
    %267 = arith.subf %266, %259 : vector<8x64xf32>
    %268 = arith.mulf %267, %265 : vector<8x64xf32>
    %269 = arith.mulf %259, %235 : vector<8x64xf32>
    %270 = arith.addf %268, %269 : vector<8x64xf32>
    %271 = arith.subf %270, %235 : vector<8x64xf32>
    %272 = arith.mulf %242, %271 : vector<8x64xf32>
    %273 = arith.addf %235, %272 : vector<8x64xf32>
    %274 = arith.mulf %242, %273 : vector<8x64xf32>
    %c6_72 = arith.constant 6 : index
    %c0_73 = arith.constant 0 : index
    %c0_74 = arith.constant 0 : index
    %275 = vector.load %arg9[%c6_72, %c0_73, %c0_74] : memref<8x8x64xf32, #tpu.memory_space<vmem>>, vector<1x8x64xf32>
    %276 = vector.shape_cast %275 : vector<1x8x64xf32> to vector<8x64xf32>
    %277 = vector.shape_cast %274 : vector<8x64xf32> to vector<1x8x64xf32>
    tpu.vector_store %arg9[%c6_72, %c0_73, %c0_74], %277 {strides = array<i32>} : memref<8x8x64xf32, #tpu.memory_space<vmem>>, vector<1x8x64xf32>,
    %278 = vector.extract_strided_slice %6 {offsets = [56, 0], sizes = [8, 192], strides = [1, 1]} : vector<64x192xf32> to vector<8x192xf32>
    %c7 = arith.constant 7 : index
    %c0_75 = arith.constant 0 : index
    %c0_76 = arith.constant 0 : index
    %279 = vector.load %arg2[%c7, %c0_75, %c0_76] : memref<8x8x64xf32, #tpu.memory_space<vmem>>, vector<1x8x64xf32>
    %280 = vector.shape_cast %279 : vector<1x8x64xf32> to vector<8x64xf32>
    %cst_77 = arith.constant dense<0.000000e+00> : vector<8x192xf32>
    %281 = tpu.matmul %273, %7, %cst_77 {dimension_numbers = #tpu.dot_dimension_numbers<[1], [0], [0], [1], [0, 0, 1, 1], [], []>} : vector<8x64xf32>, vector<64x192xf32>, vector<8x192xf32> -> vector<8x192xf32>
    %282 = vector.extract_strided_slice %278 {offsets = [0, 0], sizes = [8, 64], strides = [1, 1]} : vector<8x192xf32> to vector<8x64xf32>
    %283 = vector.extract_strided_slice %281 {offsets = [0, 0], sizes = [8, 64], strides = [1, 1]} : vector<8x192xf32> to vector<8x64xf32>
    %284 = arith.addf %282, %283 : vector<8x64xf32>
    %285 = arith.negf %284 : vector<8x64xf32>
    %286 = math.exp %285 : vector<8x64xf32>
    %cst_78 = arith.constant 1.000000e+00 : f32
    %287 = vector.broadcast %cst_78 : f32 to vector<8x64xf32>
    %288 = arith.addf %287, %286 : vector<8x64xf32>
    %289 = arith.divf %287, %288 : vector<8x64xf32>
    %290 = vector.extract_strided_slice %278 {offsets = [0, 64], sizes = [8, 64], strides = [1, 1]} : vector<8x192xf32> to vector<8x64xf32>
    %291 = vector.extract_strided_slice %281 {offsets = [0, 64], sizes = [8, 64], strides = [1, 1]} : vector<8x192xf32> to vector<8x64xf32>
    %292 = arith.addf %290, %291 : vector<8x64xf32>
    %293 = arith.negf %292 : vector<8x64xf32>
    %294 = math.exp %293 : vector<8x64xf32>
    %cst_79 = arith.constant 1.000000e+00 : f32
    %295 = vector.broadcast %cst_79 : f32 to vector<8x64xf32>
    %296 = arith.addf %295, %294 : vector<8x64xf32>
    %297 = arith.divf %295, %296 : vector<8x64xf32>
    %298 = vector.extract_strided_slice %278 {offsets = [0, 128], sizes = [8, 64], strides = [1, 1]} : vector<8x192xf32> to vector<8x64xf32>
    %299 = vector.extract_strided_slice %281 {offsets = [0, 128], sizes = [8, 64], strides = [1, 1]} : vector<8x192xf32> to vector<8x64xf32>
    %300 = arith.addf %299, %10 : vector<8x64xf32>
    %301 = arith.mulf %289, %300 : vector<8x64xf32>
    %302 = arith.addf %298, %301 : vector<8x64xf32>
    %303 = math.tanh %302 : vector<8x64xf32>
    %cst_80 = arith.constant 1.000000e+00 : f32
    %304 = vector.broadcast %cst_80 : f32 to vector<8x64xf32>
    %305 = arith.subf %304, %297 : vector<8x64xf32>
    %306 = arith.mulf %305, %303 : vector<8x64xf32>
    %307 = arith.mulf %297, %273 : vector<8x64xf32>
    %308 = arith.addf %306, %307 : vector<8x64xf32>
    %309 = arith.subf %308, %273 : vector<8x64xf32>
    %310 = arith.mulf %280, %309 : vector<8x64xf32>
    %311 = arith.addf %273, %310 : vector<8x64xf32>
    %312 = arith.mulf %280, %311 : vector<8x64xf32>
    %c7_81 = arith.constant 7 : index
    %c0_82 = arith.constant 0 : index
    %c0_83 = arith.constant 0 : index
    %313 = vector.load %arg9[%c7_81, %c0_82, %c0_83] : memref<8x8x64xf32, #tpu.memory_space<vmem>>, vector<1x8x64xf32>
    %314 = vector.shape_cast %313 : vector<1x8x64xf32> to vector<8x64xf32>
    %315 = vector.shape_cast %312 : vector<8x64xf32> to vector<1x8x64xf32>
    tpu.vector_store %arg9[%c7_81, %c0_82, %c0_83], %315 {strides = array<i32>} : memref<8x8x64xf32, #tpu.memory_space<vmem>>, vector<1x8x64xf32>,
    %c0_84 = arith.constant 0 : index
    %c0_85 = arith.constant 0 : index
    %316 = vector.load %arg7[%c0_84, %c0_85] : memref<64x32xf32, #tpu.memory_space<vmem>>, vector<64x32xf32>
    %cst_86 = arith.constant dense<0.000000e+00> : vector<8x32xf32>
    %317 = tpu.matmul %311, %316, %cst_86 {dimension_numbers = #tpu.dot_dimension_numbers<[1], [0], [0], [1], [0, 0, 1, 1], [], []>} : vector<8x64xf32>, vector<64x32xf32>, vector<8x32xf32> -> vector<8x32xf32>
    %c0_87 = arith.constant 0 : index
    %c0_88 = arith.constant 0 : index
    %318 = vector.load %arg8[%c0_87, %c0_88] : memref<1x32xf32, #tpu.memory_space<vmem>>, vector<1x32xf32>
    %319 = vector.broadcast %318 : vector<1x32xf32> to vector<8x32xf32>
    %320 = arith.addf %317, %319 : vector<8x32xf32>
    %321 = math.tanh %320 : vector<8x32xf32>
    %c0_89 = arith.constant 0 : index
    %c0_90 = arith.constant 0 : index
    %322 = vector.load %arg10[%c0_89, %c0_90] : memref<8x32xf32, #tpu.memory_space<vmem>>, vector<8x32xf32>
    tpu.vector_store %arg10[%c0_89, %c0_90], %321 {strides = array<i32>} : memref<8x32xf32, #tpu.memory_space<vmem>>, vector<8x32xf32>,
    return
  }
  func.func @transform_0(%arg0: i32) -> (i32, i32, i32) {
    %c0_i32 = arith.constant 0 : i32
    %c0_i32_0 = arith.constant 0 : i32
    %c0_i32_1 = arith.constant 0 : i32
    return %arg0, %c0_i32, %c0_i32_0 : i32, i32, i32
  }
  func.func @transform_1(%arg0: i32) -> (i32, i32, i32) {
    %c0_i32 = arith.constant 0 : i32
    %c0_i32_0 = arith.constant 0 : i32
    %c0_i32_1 = arith.constant 0 : i32
    return %c0_i32, %arg0, %c0_i32_0 : i32, i32, i32
  }
  func.func @transform_2(%arg0: i32) -> (i32, i32) {
    %c0_i32 = arith.constant 0 : i32
    %c0_i32_0 = arith.constant 0 : i32
    %c0_i32_1 = arith.constant 0 : i32
    return %c0_i32, %c0_i32_0 : i32, i32
  }
  func.func @transform_3(%arg0: i32) -> (i32, i32) {
    %c0_i32 = arith.constant 0 : i32
    %c0_i32_0 = arith.constant 0 : i32
    %c0_i32_1 = arith.constant 0 : i32
    return %c0_i32, %c0_i32_0 : i32, i32
  }
  func.func @transform_4(%arg0: i32) -> (i32, i32) {
    %c0_i32 = arith.constant 0 : i32
    %c0_i32_0 = arith.constant 0 : i32
    %c0_i32_1 = arith.constant 0 : i32
    return %c0_i32, %c0_i32_0 : i32, i32
  }
  func.func @transform_5(%arg0: i32) -> (i32, i32) {
    %c0_i32 = arith.constant 0 : i32
    %c0_i32_0 = arith.constant 0 : i32
    %c0_i32_1 = arith.constant 0 : i32
    return %c0_i32, %c0_i32_0 : i32, i32
  }
  func.func @transform_6(%arg0: i32) -> (i32, i32) {
    %c0_i32 = arith.constant 0 : i32
    %c0_i32_0 = arith.constant 0 : i32
    %c0_i32_1 = arith.constant 0 : i32
    return %c0_i32, %c0_i32_0 : i32, i32
  }
  func.func @transform_7(%arg0: i32) -> (i32, i32) {
    %c0_i32 = arith.constant 0 : i32
    %c0_i32_0 = arith.constant 0 : i32
    %c0_i32_1 = arith.constant 0 : i32
    return %c0_i32, %c0_i32_0 : i32, i32
  }
  func.func @transform_8(%arg0: i32) -> (i32, i32, i32) {
    %c0_i32 = arith.constant 0 : i32
    %c0_i32_0 = arith.constant 0 : i32
    %c0_i32_1 = arith.constant 0 : i32
    return %c0_i32, %arg0, %c0_i32_0 : i32, i32, i32
  }
  func.func @transform_9(%arg0: i32) -> (i32, i32) {
    %c0_i32 = arith.constant 0 : i32
    %c0_i32_0 = arith.constant 0 : i32
    return %arg0, %c0_i32 : i32, i32
  }
}

</mosaic_0001>

<bundles_post_ra>
// kernel: encoder_forward.1
= control target key start
LH: loop header
LB: loop body
LE: loop exit
PB: predicated region body
PF: predicated region fallthrough
CT: control target
= control target key end

     0   :  { %v1463_v3 = vmov 0.0   ;;  %vm67_vm0 = vcmask 523264   ;;  %v57_v50 = vlaneseq  ;;  %vm1466_vm1 = vmmov 0   ;;  %s1932_s2 = inlined_call_operand.vmem [shape: f32[64,192], index: 2, kind: input, shape index: {}]   ;;  %s1933_s4 = inlined_call_operand.vmem [shape: f32[64,192], index: 4, kind: input, shape index: {}]   ;;  %s1934_s0 = inlined_call_operand.vmem [shape: f32[1,64,64], index: 0, kind: input, shape index: {}]   ;;  %s1935_s3 = inlined_call_operand.vmem [shape: f32[1,192], index: 3, kind: input, shape index: {}]   ;;  %s1936_s5 = inlined_call_operand.vmem [shape: f32[1,64], index: 5, kind: input, shape index: {}]   ;;  %s1937_s1 = inlined_call_operand.vmem [shape: f32[8,8,64], index: 1, kind: input, shape index: {}]   ;;  %s1938_s8 = inlined_call_operand.vmem [shape: f32[8,8,64], index: 8, kind: output, shape index: {0}]   ;;  %s1939_s6 = inlined_call_operand.vmem [shape: f32[64,32], index: 6, kind: input, shape index: {}]   ;;  %s1940_s7 = inlined_call_operand.vmem [shape: f32[1,32], index: 7, kind: input, shape index: {}]   ;;  %s1941_s9 = inlined_call_operand.vmem [shape: f32[8,32], index: 9, kind: output, shape index: {1}]  }
   0x1   :  { %v40_v0 = vld [vmem:[%s1932_s2 + $0x8] sm:$0xff]  ;;  %v42_v1 = vld [vmem:[%s1932_s2 + $0x18] sm:$0xff]  ;;  %v39_v2 = vld [vmem:[%s1932_s2] sm:$0xff]  ;;  %156 = vmatprep.mubr.f32.mxu0 %v1463_v3  ;;  %296 = vmatprep.mubr.f32.mxu1 %v1463_v3  ;;  %vm1175_vm2 = vcmask 261120  }
   0x2   :  { %v1253_v4 = vpack.c.bf16 %v42_v1, %v40_v0  ;;  %v41_v5 = vld [vmem:[%s1932_s2 + $0x10] sm:$0xff]  ;;  %v206_v6 = vld [vmem:[%s1933_s4 + $0x8] sm:$0xff]  ;;  %v208_v7 = vld [vmem:[%s1933_s4 + $0x18] sm:$0xff]  ;;  %v58_v51 = vshrl.u32 %v57_v50, 7 }
   0x3   :  { %v1255_v8 = vpack.c.bf16 %v41_v5, %v39_v2  ;;  %v1537_v9 = vpack.c.bf16 %v208_v7, %v206_v6  ;;  %v205_v10 = vld [vmem:[%s1933_s4] sm:$0xff]  ;;  %v207_v11 = vld [vmem:[%s1933_s4 + $0x10] sm:$0xff]  ;;  %v44_v12 = vld [vmem:[%s1932_s2 + $0x28] sm:$0xff] }
   0x4   :  { %1254 = vmatprep.subr.bf16.mxu0 %v1253_v4  ;;  %v1548_v13 = vpack.c.bf16 %v207_v11, %v205_v10  ;;  %v46_v14 = vld [vmem:[%s1932_s2 + $0x38] sm:$0xff]  ;;  %v43_v15 = vld [vmem:[%s1932_s2 + $0x20] sm:$0xff]  ;;  %v45_v16 = vld [vmem:[%s1932_s2 + $0x30] sm:$0xff]  ;;  %v59_v52 = vsub.s32 0, %v58_v51  ;;  %v63_v0 = vsub.s32 1, %v58_v51 }
   0x5   :  { %1256 = vmatpush1.bf16.msra.mxu0 %v1255_v8  ;;  %1270 = vmatprep.subr.bf16.mxu1 %v1537_v9  ;;  %v1257_v17 = vpack.c.bf16 %v46_v14, %v44_v12  ;;  %v1259_v18 = vpack.c.bf16 %v45_v16, %v43_v15  ;;  %v210_v19 = vld [vmem:[%s1933_s4 + $0x28] sm:$0xff]  ;;  %v212_v20 = vld [vmem:[%s1933_s4 + $0x38] sm:$0xff]  ;;  %v209_v21 = vld [vmem:[%s1933_s4 + $0x20] sm:$0xff] }
   0x6   :  { %1272 = vmatpush1.bf16.msra.mxu1 %v1548_v13  ;;  %v1570_v22 = vpack.c.bf16 %v212_v20, %v210_v19  ;;  %v211_v23 = vld [vmem:[%s1933_s4 + $0x30] sm:$0xff]  ;;  %v48_v24 = vld [vmem:[%s1932_s2 + $0x48] sm:$0xff]  ;;  %v50_v25 = vld [vmem:[%s1932_s2 + $0x58] sm:$0xff] }
   0x7   :  { %1258 = vmatprep.subr.bf16.mxu0 %v1257_v17  ;;  %v1581_v26 = vpack.c.bf16 %v211_v23, %v209_v21  ;;  %v1261_v27 = vpack.c.bf16 %v50_v25, %v48_v24  ;;  %v47_v28 = vld [vmem:[%s1932_s2 + $0x40] sm:$0xff]  ;;  %v49_v29 = vld [vmem:[%s1932_s2 + $0x50] sm:$0xff]  ;;  %v214_v30 = vld [vmem:[%s1933_s4 + $0x48] sm:$0xff] }
   0x8   :  { %1274 = vmatprep.subr.bf16.mxu1 %v1570_v22  ;;  %v216_v31 = vld [vmem:[%s1933_s4 + $0x58] sm:$0xff]  ;;  %v213_v32 = vld [vmem:[%s1933_s4 + $0x40] sm:$0xff]  ;;  %v215_v33 = vld [vmem:[%s1933_s4 + $0x50] sm:$0xff]  ;;  %v1263_v34 = vpack.c.bf16 %v49_v29, %v47_v28 }
   0x9   :  { %1260 = vmatpush1.bf16.msra.mxu0 %v1259_v18  ;;  %v1602_v35 = vpack.c.bf16 %v216_v31, %v214_v30  ;;  %v52_v36 = vld [vmem:[%s1932_s2 + $0x68] sm:$0xff]  ;;  %v54_v37 = vld [vmem:[%s1932_s2 + $0x78] sm:$0xff]  ;;  %v51_v38 = vld [vmem:[%s1932_s2 + $0x60] sm:$0xff]  ;;  %v1614_v39 = vpack.c.bf16 %v215_v33, %v213_v32 }
   0xa   :  { %1276 = vmatpush1.bf16.msra.mxu1 %v1581_v26  ;;  %1262 = vmatprep.subr.bf16.mxu0 %v1261_v27  ;;  %v1265_v40 = vpack.c.bf16 %v54_v37, %v52_v36  ;;  %v53_v41 = vld [vmem:[%s1932_s2 + $0x70] sm:$0xff]  ;;  %v218_v42 = vld [vmem:[%s1933_s4 + $0x68] sm:$0xff]  ;;  %v220_v43 = vld [vmem:[%s1933_s4 + $0x78] sm:$0xff] }
   0xb   :  { %1278 = vmatprep.subr.bf16.mxu1 %v1602_v35  ;;  %v1626_v44 = vpack.c.bf16 %v220_v43, %v218_v42  ;;  %v217_v45 = vld [vmem:[%s1933_s4 + $0x60] sm:$0xff]  ;;  %v219_v46 = vld [vmem:[%s1933_s4 + $0x70] sm:$0xff]  ;;  %v1267_v47 = vpack.c.bf16 %v53_v41, %v51_v38  ;;  %v32_v10 = vld [vmem:[%s1934_s0 + $0x8] sm:$0xff] }
   0xc   :  { %v1635_v48 = vpack.c.bf16 %v219_v46, %v217_v45  ;;  %v31_v49 = vld [vmem:[%s1934_s0] sm:$0xff]  ;;  %v34_v42 = vld [vmem:[%s1934_s0 + $0x18] sm:$0xff]  ;;  %v36_v45 = vld [vmem:[%s1934_s0 + $0x28] sm:$0xff] }
   0xd   :  { %1264 = vmatpush1.bf16.msra.mxu0 %v1263_v34  ;;  %v55_v53 = vld [vmem:[%s1935_s3] sm:$0x3]  ;;  %v37_v46 = vld [vmem:[%s1934_s0 + $0x30] sm:$0xff] }
   0xe   :  { %1280 = vmatpush1.bf16.msra.mxu1 %v1614_v39  ;;  %1266 = vmatprep.subr.bf16.mxu0 %v1265_v40  ;;  %v1667_v54 = vrot.slane %v55_v53, %v59_v52  ;;  %v1673_v1 = vld [vmem:[%s1936_s5] ss:$0 sm:$0xff]  ;;  %v1675_v2 = vrot.slane %v55_v53, %v63_v0  ;;  %s1464_s5 = smov 64   ;;  %v33_v40 = vld [vmem:[%s1934_s0 + $0x10] sm:$0xff]  ;;  %v1195_v0 = vld [vmem:[%s1937_s1 + $0x8] sm:$0xff] }
   0xf   :  { %1282 = vmatprep.subr.bf16.mxu1 %v1626_v44  ;;  %v228_v20 = vld [vmem:[%s1937_s1] sm:$0xff] }
  0x10   :  { %v35_v43 = vld [vmem:[%s1934_s0 + $0x20] sm:$0xff] }
  0x11   :  { %1268 = vmatpush1.bf16.msra.mxu0 %v1267_v47  ;;  %v38_v47 = vld [vmem:[%s1934_s0 + $0x38] sm:$0xff] }
  0x12   :  { %1284 = vmatpush1.bf16.msra.mxu1 %v1635_v48  ;;  %1302 = vmatprep.subr.bf16.mxu0 %v1537_v9 }
  0x13   :  { %1286 = vmatprep.subr.bf16.mxu1 %v1537_v9 }
  0x14   :  { %1185 = vmatmul.mubr.msk.f32.vlgmr.msra.gmra.mrb[0].mxu0 %vm67_vm0, %v31_v49 }
  0x15   :  { %297 = vmatmul.mubr.f32.vlgmr.msra.gmra.mrb[0].mxu1 %v1463_v3  ;;  %162 = vmatprep.mubr.f32.mxu0 %v1463_v3 }
  0x16   :  { %1288 = vmatpush1.bf16.msra.mxu1 %v1548_v13  ;;  %399 = vmatprep.mubr.f32.mxu1 %v1463_v3 }
  0x17   :  { %1290 = vmatprep.subr.bf16.mxu1 %v1570_v22  ;;  %1304 = vmatpush1.bf16.msra.mxu0 %v1548_v13 }
  0x18   :  { %1306 = vmatprep.subr.bf16.mxu0 %v1570_v22  ;;  %1186 = vmatmul.mubr.msk.f32.gmra.mrb[2].mxu0 %vm67_vm0, %v32_v10 }
  0x19   :  { %168 = vmatprep.mubr.f32.mxu0 %v1463_v3 }
  0x1a   :  { %1292 = vmatpush1.bf16.msra.mxu1 %v1581_v26 }
  0x1b   :  { %1294 = vmatprep.subr.bf16.mxu1 %v1602_v35  ;;  %1308 = vmatpush1.bf16.msra.mxu0 %v1581_v26 }
  0x1c   :  { %1310 = vmatprep.subr.bf16.mxu0 %v1602_v35  ;;  %1187 = vmatmul.mubr.msk.f32.gmra.mrb[4].mxu0 %vm67_vm0, %v33_v40 }
  0x1d   :  { %174 = vmatprep.mubr.f32.mxu0 %v1463_v3 }
  0x1e   :  { %1296 = vmatpush1.bf16.msra.mxu1 %v1614_v39 }
  0x1f   :  { %1298 = vmatprep.subr.bf16.mxu1 %v1626_v44  ;;  %1312 = vmatpush1.bf16.msra.mxu0 %v1614_v39 }
  0x20   :  { %1314 = vmatprep.subr.bf16.mxu0 %v1626_v44  ;;  %1188 = vmatmul.mubr.msk.f32.gmra.mrb[6].mxu0 %vm67_vm0, %v34_v42 }
  0x21   :  { %180 = vmatprep.mubr.f32.mxu0 %v1463_v3 }
  0x22   :  { %1300 = vmatpush1.bf16.msra.mxu1 %v1635_v48 }
  0x23   :  { %1316 = vmatpush1.bf16.msra.mxu0 %v1635_v48  ;;  %1318 = vmatprep.subr.bf16.mxu1 %v1537_v9 }
  0x24   :  { %1334 = vmatprep.subr.bf16.mxu0 %v1537_v9  ;;  %1189 = vmatmul.mubr.msk.f32.gmra.mrb[8].mxu0 %vm67_vm0, %v35_v43 }
  0x25   :  { %186 = vmatprep.mubr.f32.mxu0 %v1463_v3 }
  0x28   :  { %1190 = vmatmul.mubr.msk.f32.gmra.mrb[10].mxu0 %vm67_vm0, %v36_v45 }
  0x29   :  { %192 = vmatprep.mubr.f32.mxu0 %v1463_v3 }
  0x2c   :  { %1191 = vmatmul.mubr.msk.f32.gmra.mrb[12].mxu0 %vm67_vm0, %v37_v46 }
  0x2d   :  { %198 = vmatprep.mubr.f32.mxu0 %v1463_v3 }
  0x30   :  { %1192 = vmatmul.mubr.msk.f32.gmra.mrb[14].mxu0 %vm67_vm0, %v38_v47 }
  0x31   :  { %507 = vmatprep.mubr.f32.mxu0 %v1463_v3 }
  0xe7   :  { %v158_v55 = vpop.f32.mrb[0].mxu0 }
  0xe8   :  { %v159_v56 = vadd.f32 %v158_v55, %v1667_v54  ;;  %v160_v57 = vpop.f32.mrb[1].mxu0  ;;  %v298_v58 = vpop.f32.mrb[0].mxu1 }
  0xe9   :  { %v300_v59 = vpop.f32.mrb[1].mxu1  ;;  %v161_v6 = vadd.f32 %v160_v57, %v1675_v2 }
  0xea   :  { %v303_v60 = vadd.f32 %v298_v58, %v159_v56  ;;  %v310_v4 = vadd.f32 %v1673_v1, %v300_v59 }
  0xeb   :  { %v164_v18 = vpop.f32.mrb[2].mxu0 }
  0xec   :  { %v1194_v61 = vmul.f32 -1.442695, %v303_v60  ;;  %v166_v19 = vpop.f32.mrb[3].mxu0  ;;  %v165_v25 = vadd.f32 %v164_v18, %v1667_v54 }
  0xed   :  { %v167_v36 = vadd.f32 %v166_v19, %v1675_v2 }
  0xee   :  { %1413 = vpow2.f32 %v1194_v61 }
  0xef   :  { %v170_v57 = vpop.f32.mrb[4].mxu0 }
  0xf0   :  { %v172_v58 = vpop.f32.mrb[5].mxu0 }
  0xf3   :  { %v1744_v59 = vpop.f32.mrb[6].mxu0 }
  0xf4   :  { %v1746_v60 = vpop.f32.mrb[7].mxu0  ;;  %v177_v45 = vadd.f32 %v1744_v59, %v1667_v54 }
  0xf7   :  { %v1748_v61 = vpop.f32.mrb[8].mxu0 }
  0xf8   :  { %v1414_v62 = vpop.eup %1413 }
  0xf9   :  { %v307_v63 = vadd.f32 1.0, %v1414_v62  ;;  %v1750_v62 = vpop.f32.mrb[9].mxu0 }
  0xfb   :  { %1415 = vrcp.f32 %v307_v63  ;;  %v1752_v63 = vpop.f32.mrb[10].mxu0 }
 0x105   :  { %v1416_v5 = vpop.eup %1415 }
 0x106   :  { %v311_v7 = vmul.f32 %v1416_v5, %v310_v4  ;;  %v314_v12 = vsub.f32 1.0, %v1416_v5  ;;  %v320_v15 = vmul.f32 0.0, %v1416_v5  ;;  %v1757_v4 = vpop.f32.mrb[11].mxu0 }
 0x107   :  { %v1759_v5 = vpop.f32.mrb[12].mxu0 }
 0x108   :  { %v312_v8 = vadd.f32 %v311_v7, %v161_v6  ;;  %v1761_v7 = vpop.f32.mrb[13].mxu0 }
 0x109   :  { %v1763_v10 = vpop.f32.mrb[14].mxu0 }
 0x10a   :  { %1417 = vtanh.f32 %v312_v8 }
 0x114   :  { %v1418_v11 = vpop.eup %1417 }
 0x115   :  { %316 = vrot.lane.b32.xlu0 %v1418_v11, %s1464_s5  ;;  %v1765_v11 = vpop.f32.mrb[15].mxu0 }
 0x187   :  { %v317_v14 = vpop.permute.xlu0 %316 }
 0x188   :  { %v319_v16 = vmul.f32 %v317_v14, %v314_v12 }
 0x18a   :  { %v321_v17 = vadd.f32 %v320_v15, %v319_v16  ;;  %v171_v15 = vadd.f32 %v170_v57, %v1667_v54 }
 0x18c   :  { %323 = vrot.lane.b32.xlu0 %v321_v17, %s1464_s5 }
 0x1fe   :  { %v324_v21 = vpop.permute.xlu0 %323 }
 0x1ff   :  { %v1689_v23 = vmul.f32 %v324_v21, %v228_v20 }
 0x201   :  { %v328_v24 = vmul.f32 %v1689_v23, %v228_v20  ;;  %1196 = vmatmul.mubr.msk.f32.vlgmr.msra.gmra.mrb[2].mxu1 %vm67_vm0, %v1689_v23 }
 0x202   :  { %1320 = vmatpush1.bf16.msra.mxu1 %v1548_v13  ;;  %615 = vmatprep.mubr.f32.mxu1 %v1463_v3 }
 0x203   :  { %329 = vst.msk [vmem:[%s1938_s8] sm:$0xff] %vm67_vm0, %v328_v24  ;;  %1322 = vmatprep.subr.bf16.mxu1 %v1570_v22 }
 0x206   :  { %1324 = vmatpush1.bf16.msra.mxu1 %v1581_v26 }
 0x207   :  { %1326 = vmatprep.subr.bf16.mxu1 %v1602_v35 }
 0x20a   :  { %1328 = vmatpush1.bf16.msra.mxu1 %v1614_v39 }
 0x20b   :  { %1330 = vmatprep.subr.bf16.mxu1 %v1626_v44 }
 0x20e   :  { %1332 = vmatpush1.bf16.msra.mxu1 %v1635_v48 }
 0x20f   :  { %1350 = vmatprep.subr.bf16.mxu1 %v1537_v9 }
 0x2d4   :  { %v401_v27 = vpop.f32.mrb[2].mxu1 }
 0x2d5   :  { %v406_v28 = vadd.f32 %v401_v27, %v165_v25  ;;  %v403_v29 = vpop.f32.mrb[3].mxu1  ;;  %v173_v25 = vadd.f32 %v172_v58, %v1675_v2 }
 0x2d6   :  { %v413_v33 = vadd.f32 %v1673_v1, %v403_v29 }
 0x2d7   :  { %v1197_v30 = vmul.f32 -1.442695, %v406_v28 }
 0x2d9   :  { %1419 = vpow2.f32 %v1197_v30 }
 0x2e3   :  { %v1420_v31 = vpop.eup %1419 }
 0x2e4   :  { %v410_v32 = vadd.f32 1.0, %v1420_v31 }
 0x2e6   :  { %1421 = vrcp.f32 %v410_v32 }
 0x2f0   :  { %v1422_v34 = vpop.eup %1421 }
 0x2f1   :  { %v414_v37 = vmul.f32 %v1422_v34, %v413_v33  ;;  %v417_v50 = vsub.f32 1.0, %v1422_v34 }
 0x2f3   :  { %v415_v38 = vadd.f32 %v414_v37, %v167_v36 }
 0x2f5   :  { %1423 = vtanh.f32 %v415_v38  ;;  %v1199_v38 = vld [vmem:[%s1937_s1 + $0x10] sm:$0xff] }
 0x2ff   :  { %v1424_v41 = vpop.eup %1423 }
 0x300   :  { %419 = vrot.lane.b32.xlu1 %v1424_v41, %s1464_s5 }
 0x304   :  { %423 = vrot.lane.b32.xlu1 %v1689_v23, %s1464_s5 }
 0x372   :  { %v420_v49 = vpop.permute.xlu1 %419 }
 0x373   :  { %v422_v52 = vmul.f32 %v420_v49, %v417_v50 }
 0x376   :  { %v424_v51 = vpop.permute.xlu1 %423 }
 0x377   :  { %v426_v53 = vmul.f32 %v1422_v34, %v424_v51 }
 0x379   :  { %v427_v55 = vadd.f32 %v426_v53, %v422_v52 }
 0x37b   :  { %v428_v56 = vsub.f32 %v427_v55, %v424_v51 }
 0x37d   :  { %430 = vrot.lane.b32.xlu0 %v428_v56, %s1464_s5  ;;  %v179_v56 = vadd.f32 %v1746_v60, %v1675_v2 }
 0x3ef   :  { %v431_v6 = vpop.permute.xlu0 %430 }
 0x3f0   :  { %v433_v8 = vmul.f32 %v1195_v0, %v431_v6 }
 0x3f2   :  { %v434_v12 = vadd.f32 %v433_v8, %v1689_v23 }
 0x3f4   :  { %v435_v14 = vmul.f32 %v1195_v0, %v434_v12  ;;  %531 = vrot.lane.b32.xlu0 %v434_v12, %s1464_s5  ;;  %1200 = vmatmul.mubr.msk.f32.vlgmr.msra.gmra.mrb[16].mxu0 %vm67_vm0, %v434_v12 }
 0x3f5   :  { %1336 = vmatpush1.bf16.msra.mxu0 %v1548_v13  ;;  %723 = vmatprep.mubr.f32.mxu0 %v1463_v3 }
 0x3f6   :  { %1198 = vst.msk [vmem:[%s1938_s8 + $0x8] sm:$0xff] %vm67_vm0, %v435_v14  ;;  %1338 = vmatprep.subr.bf16.mxu0 %v1570_v22 }
 0x3f9   :  { %1340 = vmatpush1.bf16.msra.mxu0 %v1581_v26 }
 0x3fa   :  { %1342 = vmatprep.subr.bf16.mxu0 %v1602_v35 }
 0x3fd   :  { %1344 = vmatpush1.bf16.msra.mxu0 %v1614_v39 }
 0x3fe   :  { %1346 = vmatprep.subr.bf16.mxu0 %v1626_v44 }
 0x401   :  { %1348 = vmatpush1.bf16.msra.mxu0 %v1635_v48 }
 0x402   :  { %1366 = vmatprep.subr.bf16.mxu0 %v1537_v9 }
 0x466   :  { %v532_v31 = vpop.permute.xlu0 %531 }
 0x4c7   :  { %v509_v16 = vpop.f32.mrb[16].mxu0 }
 0x4c8   :  { %v514_v17 = vadd.f32 %v509_v16, %v171_v15  ;;  %v511_v18 = vpop.f32.mrb[17].mxu0  ;;  %v1203_v16 = vld [vmem:[%s1937_s1 + $0x18] sm:$0xff] }
 0x4c9   :  { %v521_v23 = vadd.f32 %v1673_v1, %v511_v18 }
 0x4ca   :  { %v1201_v19 = vmul.f32 -1.442695, %v514_v17 }
 0x4cc   :  { %1425 = vpow2.f32 %v1201_v19 }
 0x4d6   :  { %v1426_v20 = vpop.eup %1425 }
 0x4d7   :  { %v518_v21 = vadd.f32 1.0, %v1426_v20  ;;  %v183_v20 = vadd.f32 %v1748_v61, %v1667_v54 }
 0x4d9   :  { %1427 = vrcp.f32 %v518_v21 }
 0x4e3   :  { %v1428_v24 = vpop.eup %1427 }
 0x4e4   :  { %v522_v27 = vmul.f32 %v1428_v24, %v521_v23  ;;  %v525_v30 = vsub.f32 1.0, %v1428_v24  ;;  %v534_v33 = vmul.f32 %v1428_v24, %v532_v31 }
 0x4e6   :  { %v523_v28 = vadd.f32 %v522_v27, %v173_v25 }
 0x4e8   :  { %1429 = vtanh.f32 %v523_v28 }
 0x4f2   :  { %v1430_v29 = vpop.eup %1429 }
 0x4f3   :  { %527 = vrot.lane.b32.xlu1 %v1430_v29, %s1464_s5 }
 0x565   :  { %v528_v32 = vpop.permute.xlu1 %527 }
 0x566   :  { %v530_v34 = vmul.f32 %v528_v32, %v525_v30 }
 0x568   :  { %v535_v36 = vadd.f32 %v534_v33, %v530_v34 }
 0x56a   :  { %v536_v37 = vsub.f32 %v535_v36, %v532_v31  ;;  %v185_v31 = vadd.f32 %v1750_v62, %v1675_v2 }
 0x56c   :  { %538 = vrot.lane.b32.xlu1 %v536_v37, %s1464_s5 }
 0x5de   :  { %v539_v40 = vpop.permute.xlu1 %538 }
 0x5df   :  { %v541_v41 = vmul.f32 %v1199_v38, %v539_v40 }
 0x5e1   :  { %v542_v42 = vadd.f32 %v541_v41, %v434_v12 }
 0x5e3   :  { %v543_v43 = vmul.f32 %v1199_v38, %v542_v42  ;;  %639 = vrot.lane.b32.xlu1 %v542_v42, %s1464_s5  ;;  %1204 = vmatmul.mubr.msk.f32.vlgmr.msra.gmra.mrb[4].mxu1 %vm67_vm0, %v542_v42 }
 0x5e4   :  { %1352 = vmatpush1.bf16.msra.mxu1 %v1548_v13  ;;  %831 = vmatprep.mubr.f32.mxu1 %v1463_v3 }
 0x5e5   :  { %1202 = vst.msk [vmem:[%s1938_s8 + $0x10] sm:$0xff] %vm67_vm0, %v543_v43  ;;  %1354 = vmatprep.subr.bf16.mxu1 %v1570_v22  ;;  %v1207_v43 = vld [vmem:[%s1937_s1 + $0x20] sm:$0xff] }
 0x5e8   :  { %1356 = vmatpush1.bf16.msra.mxu1 %v1581_v26 }
 0x5e9   :  { %1358 = vmatprep.subr.bf16.mxu1 %v1602_v35 }
 0x5ec   :  { %1360 = vmatpush1.bf16.msra.mxu1 %v1614_v39 }
 0x5ed   :  { %1362 = vmatprep.subr.bf16.mxu1 %v1626_v44 }
 0x5f0   :  { %1364 = vmatpush1.bf16.msra.mxu1 %v1635_v48 }
 0x5f1   :  { %1382 = vmatprep.subr.bf16.mxu1 %v1537_v9 }
 0x655   :  { %v640_v0 = vpop.permute.xlu1 %639 }
 0x6b6   :  { %v617_v46 = vpop.f32.mrb[4].mxu1 }
 0x6b7   :  { %v622_v47 = vadd.f32 %v617_v46, %v177_v45  ;;  %v619_v49 = vpop.f32.mrb[5].mxu1 }
 0x6b8   :  { %v629_v53 = vadd.f32 %v1673_v1, %v619_v49 }
 0x6b9   :  { %v1205_v50 = vmul.f32 -1.442695, %v622_v47 }
 0x6bb   :  { %1431 = vpow2.f32 %v1205_v50 }
 0x6c5   :  { %v1432_v51 = vpop.eup %1431 }
 0x6c6   :  { %v626_v52 = vadd.f32 1.0, %v1432_v51 }
 0x6c8   :  { %1433 = vrcp.f32 %v626_v52 }
 0x6d2   :  { %v1434_v55 = vpop.eup %1433 }
 0x6d3   :  { %v630_v57 = vmul.f32 %v1434_v55, %v629_v53  ;;  %v633_v59 = vsub.f32 1.0, %v1434_v55  ;;  %v642_v8 = vmul.f32 %v1434_v55, %v640_v0 }
 0x6d5   :  { %v631_v58 = vadd.f32 %v630_v57, %v179_v56 }
 0x6d7   :  { %1435 = vtanh.f32 %v631_v58 }
 0x6e1   :  { %v1436_v9 = vpop.eup %1435 }
 0x6e2   :  { %635 = vrot.lane.b32.xlu0 %v1436_v9, %s1464_s5 }
 0x754   :  { %v636_v6 = vpop.permute.xlu0 %635 }
 0x755   :  { %v638_v12 = vmul.f32 %v636_v6, %v633_v59  ;;  %v1211_v6 = vld [vmem:[%s1937_s1 + $0x28] sm:$0xff] }
 0x757   :  { %v643_v14 = vadd.f32 %v642_v8, %v638_v12 }
 0x759   :  { %v644_v15 = vsub.f32 %v643_v14, %v640_v0 }
 0x75b   :  { %646 = vrot.lane.b32.xlu0 %v644_v15, %s1464_s5  ;;  %v195_v15 = vadd.f32 %v1759_v5, %v1667_v54 }
 0x7cd   :  { %v647_v60 = vpop.permute.xlu0 %646 }
 0x7ce   :  { %v649_v17 = vmul.f32 %v1203_v16, %v647_v60 }
 0x7d0   :  { %v650_v18 = vadd.f32 %v649_v17, %v542_v42 }
 0x7d2   :  { %v651_v19 = vmul.f32 %v1203_v16, %v650_v18  ;;  %747 = vrot.lane.b32.xlu0 %v650_v18, %s1464_s5  ;;  %1208 = vmatmul.mubr.msk.f32.vlgmr.msra.gmra.mrb[18].mxu0 %vm67_vm0, %v650_v18 }
 0x7d3   :  { %1368 = vmatpush1.bf16.msra.mxu0 %v1548_v13  ;;  %939 = vmatprep.mubr.f32.mxu0 %v1463_v3 }
 0x7d4   :  { %1206 = vst.msk [vmem:[%s1938_s8 + $0x18] sm:$0xff] %vm67_vm0, %v651_v19  ;;  %1370 = vmatprep.subr.bf16.mxu0 %v1570_v22 }
 0x7d7   :  { %1372 = vmatpush1.bf16.msra.mxu0 %v1581_v26 }
 0x7d8   :  { %1374 = vmatprep.subr.bf16.mxu0 %v1602_v35 }
 0x7db   :  { %1376 = vmatpush1.bf16.msra.mxu0 %v1614_v39 }
 0x7dc   :  { %1378 = vmatprep.subr.bf16.mxu0 %v1626_v44 }
 0x7df   :  { %1380 = vmatpush1.bf16.msra.mxu0 %v1635_v48 }
 0x844   :  { %v748_v36 = vpop.permute.xlu0 %747 }
 0x8a5   :  { %v725_v21 = vpop.f32.mrb[18].mxu0 }
 0x8a6   :  { %v730_v23 = vadd.f32 %v725_v21, %v183_v20  ;;  %v727_v24 = vpop.f32.mrb[19].mxu0 }
 0x8a7   :  { %v737_v29 = vadd.f32 %v1673_v1, %v727_v24  ;;  %v197_v24 = vadd.f32 %v1761_v7, %v1675_v2 }
 0x8a8   :  { %v1209_v25 = vmul.f32 -1.442695, %v730_v23 }
 0x8aa   :  { %1437 = vpow2.f32 %v1209_v25 }
 0x8b4   :  { %v1438_v27 = vpop.eup %1437 }
 0x8b5   :  { %v734_v28 = vadd.f32 1.0, %v1438_v27 }
 0x8b7   :  { %1439 = vrcp.f32 %v734_v28 }
 0x8c1   :  { %v1440_v30 = vpop.eup %1439 }
 0x8c2   :  { %v738_v32 = vmul.f32 %v1440_v30, %v737_v29  ;;  %v741_v61 = vsub.f32 1.0, %v1440_v30  ;;  %v750_v38 = vmul.f32 %v1440_v30, %v748_v36 }
 0x8c4   :  { %v739_v33 = vadd.f32 %v738_v32, %v185_v31 }
 0x8c6   :  { %1441 = vtanh.f32 %v739_v33 }
 0x8d0   :  { %v1442_v34 = vpop.eup %1441 }
 0x8d1   :  { %743 = vrot.lane.b32.xlu1 %v1442_v34, %s1464_s5 }
 0x943   :  { %v744_v37 = vpop.permute.xlu1 %743 }
 0x944   :  { %v746_v40 = vmul.f32 %v744_v37, %v741_v61  ;;  %v1215_v61 = vld [vmem:[%s1937_s1 + $0x30] sm:$0xff] }
 0x946   :  { %v751_v41 = vadd.f32 %v750_v38, %v746_v40  ;;  %v201_v40 = vadd.f32 %v1763_v10, %v1667_v54  ;;  %v1087_v10 = vld [vmem:[%s1939_s6 + $0x8] sm:$0xff] }
 0x948   :  { %v752_v42 = vsub.f32 %v751_v41, %v748_v36 }
 0x94a   :  { %754 = vrot.lane.b32.xlu1 %v752_v42, %s1464_s5 }
 0x9bc   :  { %v755_v62 = vpop.permute.xlu1 %754 }
 0x9bd   :  { %v757_v45 = vmul.f32 %v1207_v43, %v755_v62 }
 0x9bf   :  { %v758_v46 = vadd.f32 %v757_v45, %v650_v18 }
 0x9c1   :  { %v759_v47 = vmul.f32 %v1207_v43, %v758_v46  ;;  %855 = vrot.lane.b32.xlu1 %v758_v46, %s1464_s5  ;;  %1212 = vmatmul.mubr.msk.f32.vlgmr.msra.gmra.mrb[6].mxu1 %vm67_vm0, %v758_v46 }
 0x9c2   :  { %1384 = vmatpush1.bf16.msra.mxu1 %v1548_v13  ;;  %1047 = vmatprep.mubr.f32.mxu1 %v1463_v3  ;;  %v189_v13 = vadd.f32 %v1752_v63, %v1667_v54  ;;  %v1086_v54 = vld [vmem:[%s1939_s6] sm:$0xff] }
 0x9c3   :  { %1210 = vst.msk [vmem:[%s1938_s8 + $0x20] sm:$0xff] %vm67_vm0, %v759_v47  ;;  %1386 = vmatprep.subr.bf16.mxu1 %v1570_v22 }
 0x9c6   :  { %1388 = vmatpush1.bf16.msra.mxu1 %v1581_v26 }
 0x9c7   :  { %1390 = vmatprep.subr.bf16.mxu1 %v1602_v35 }
 0x9ca   :  { %1392 = vmatpush1.bf16.msra.mxu1 %v1614_v39  ;;  %v191_v39 = vadd.f32 %v1757_v4, %v1675_v2 }
 0x9cb   :  { %1394 = vmatprep.subr.bf16.mxu1 %v1626_v44 }
 0x9ce   :  { %1396 = vmatpush1.bf16.msra.mxu1 %v1635_v48 }
 0xa33   :  { %v856_v56 = vpop.permute.xlu1 %855 }
 0xa94   :  { %v833_v49 = vpop.f32.mrb[6].mxu1 }
 0xa95   :  { %v838_v50 = vadd.f32 %v833_v49, %v189_v13  ;;  %v835_v51 = vpop.f32.mrb[7].mxu1  ;;  %v203_v49 = vadd.f32 %v1765_v11, %v1675_v2  ;;  %v1089_v2 = vld [vmem:[%s1939_s6 + $0x18] sm:$0xff] }
 0xa96   :  { %v845_v26 = vadd.f32 %v1673_v1, %v835_v51 }
 0xa97   :  { %v1213_v52 = vmul.f32 -1.442695, %v838_v50 }
 0xa99   :  { %1443 = vpow2.f32 %v1213_v52  ;;  %v1465_v52 = vmov 0.0|0.0  }
 0xa9a   :  { %1397 = vmatprep.subr.bf16.mxu0 %v1465_v52 }
 0xaa3   :  { %v1444_v53 = vpop.eup %1443 }
 0xaa4   :  { %v842_v22 = vadd.f32 1.0, %v1444_v53  ;;  %v1398_v53 = vpack.c.bf16 %v1087_v10, %v1086_v54 }
 0xaa6   :  { %1445 = vrcp.f32 %v842_v22  ;;  %v1090_v22 = vld [vmem:[%s1939_s6 + $0x20] sm:$0xff] }
 0xab0   :  { %v1446_v35 = vpop.eup %1445 }
 0xab1   :  { %v846_v44 = vmul.f32 %v1446_v35, %v845_v26  ;;  %v849_v63 = vsub.f32 1.0, %v1446_v35  ;;  %v858_v58 = vmul.f32 %v1446_v35, %v856_v56  ;;  %v1091_v26 = vld [vmem:[%s1939_s6 + $0x28] sm:$0xff] }
 0xab3   :  { %v847_v55 = vadd.f32 %v846_v44, %v191_v39  ;;  %v1404_v39 = vpack.c.bf16 %v1091_v26, %v1090_v22  ;;  %v1092_v44 = vld [vmem:[%s1939_s6 + $0x30] sm:$0xff] }
 0xab5   :  { %1447 = vtanh.f32 %v847_v55  ;;  %v1093_v55 = vld [vmem:[%s1939_s6 + $0x38] sm:$0xff] }
 0xabf   :  { %v1448_v48 = vpop.eup %1447 }
 0xac0   :  { %851 = vrot.lane.b32.xlu0 %v1448_v48, %s1464_s5  ;;  %v1407_v48 = vpack.c.bf16 %v1093_v55, %v1092_v44 }
 0xb32   :  { %v852_v57 = vpop.permute.xlu0 %851 }
 0xb33   :  { %v854_v9 = vmul.f32 %v852_v57, %v849_v63 }
 0xb35   :  { %v859_v59 = vadd.f32 %v858_v58, %v854_v9 }
 0xb37   :  { %v860_v0 = vsub.f32 %v859_v59, %v856_v56 }
 0xb39   :  { %862 = vrot.lane.b32.xlu0 %v860_v0, %s1464_s5 }
 0xbab   :  { %v863_v4 = vpop.permute.xlu0 %862 }
 0xbac   :  { %v865_v8 = vmul.f32 %v1211_v6, %v863_v4 }
 0xbae   :  { %v866_v12 = vadd.f32 %v865_v8, %v758_v46 }
 0xbb0   :  { %v867_v14 = vmul.f32 %v1211_v6, %v866_v12  ;;  %963 = vrot.lane.b32.xlu0 %v866_v12, %s1464_s5  ;;  %1216 = vmatmul.mubr.msk.f32.vlgmr.msra.gmra.mrb[20].mxu0 %vm67_vm0, %v866_v12  ;;  %v1219_v6 = vld [vmem:[%s1937_s1 + $0x38] sm:$0xff] }
 0xbb1   :  { %1399 = vmatpush3.bf16.msra.mxu0 %v1398_v53  ;;  %1250 = vmatprep.mubr.msk.f32.mxu0 %vm1466_vm1, %v1463_v3  ;;  %v1223_v3 = vld [vmem:[%s1940_s7] ss:$0 sm:$0xff] }
 0xbb2   :  { %1214 = vst.msk [vmem:[%s1938_s8 + $0x28] sm:$0xff] %vm67_vm0, %v867_v14  ;;  %1400 = vmatprep.subr.bf16.mxu0 %v1465_v52 }
 0xc22   :  { %v964_v29 = vpop.permute.xlu0 %963 }
 0xc83   :  { %v941_v16 = vpop.f32.mrb[20].mxu0 }
 0xc84   :  { %v946_v60 = vadd.f32 %v941_v16, %v195_v15  ;;  %v943_v17 = vpop.f32.mrb[21].mxu0 }
 0xc85   :  { %v953_v21 = vadd.f32 %v1673_v1, %v943_v17 }
 0xc86   :  { %v1217_v18 = vmul.f32 -1.442695, %v946_v60 }
 0xc88   :  { %1449 = vpow2.f32 %v1217_v18 }
 0xc92   :  { %v1450_v19 = vpop.eup %1449 }
 0xc93   :  { %v950_v20 = vadd.f32 1.0, %v1450_v19 }
 0xc95   :  { %1451 = vrcp.f32 %v950_v20 }
 0xc9f   :  { %v1452_v23 = vpop.eup %1451 }
 0xca0   :  { %v954_v25 = vmul.f32 %v1452_v23, %v953_v21  ;;  %v957_v5 = vsub.f32 1.0, %v1452_v23  ;;  %v966_v31 = vmul.f32 %v1452_v23, %v964_v29 }
 0xca2   :  { %v955_v27 = vadd.f32 %v954_v25, %v197_v24 }
 0xca4   :  { %1453 = vtanh.f32 %v955_v27 }
 0xcae   :  { %v1454_v28 = vpop.eup %1453 }
 0xcaf   :  { %959 = vrot.lane.b32.xlu1 %v1454_v28, %s1464_s5 }
 0xd21   :  { %v960_v30 = vpop.permute.xlu1 %959 }
 0xd22   :  { %v962_v32 = vmul.f32 %v960_v30, %v957_v5 }
 0xd24   :  { %v967_v33 = vadd.f32 %v966_v31, %v962_v32 }
 0xd26   :  { %v968_v34 = vsub.f32 %v967_v33, %v964_v29 }
 0xd28   :  { %970 = vrot.lane.b32.xlu1 %v968_v34, %s1464_s5 }
 0xd9a   :  { %v971_v7 = vpop.permute.xlu1 %970 }
 0xd9b   :  { %v973_v36 = vmul.f32 %v1215_v61, %v971_v7 }
 0xd9d   :  { %v974_v37 = vadd.f32 %v973_v36, %v866_v12 }
 0xd9f   :  { %v975_v38 = vmul.f32 %v1215_v61, %v974_v37  ;;  %1071 = vrot.lane.b32.xlu1 %v974_v37, %s1464_s5  ;;  %1220 = vmatmul.mubr.msk.f32.vlgmr.msra.gmra.mrb[8].mxu1 %vm67_vm0, %v974_v37 }
 0xda1   :  { %1218 = vst.msk [vmem:[%s1938_s8 + $0x30] sm:$0xff] %vm67_vm0, %v975_v38 }
 0xe11   :  { %v1072_v56 = vpop.permute.xlu1 %1071 }
 0xe72   :  { %v1049_v41 = vpop.f32.mrb[8].mxu1 }
 0xe73   :  { %v1054_v42 = vadd.f32 %v1049_v41, %v201_v40  ;;  %v1051_v43 = vpop.f32.mrb[9].mxu1 }
 0xe74   :  { %v1061_v47 = vadd.f32 %v1673_v1, %v1051_v43  ;;  %v1088_v1 = vld [vmem:[%s1939_s6 + $0x10] sm:$0xff] }
 0xe75   :  { %v1221_v62 = vmul.f32 -1.442695, %v1054_v42  ;;  %v1401_v11 = vpack.c.bf16 %v1089_v2, %v1088_v1 }
 0xe77   :  { %1455 = vpow2.f32 %v1221_v62  ;;  %1402 = vmatpush3.bf16.msra.mxu0 %v1401_v11 }
 0xe78   :  { %1403 = vmatprep.subr.bf16.mxu0 %v1465_v52 }
 0xe7b   :  { %1405 = vmatpush3.bf16.msra.mxu0 %v1404_v39 }
 0xe7c   :  { %1406 = vmatprep.subr.bf16.mxu0 %v1465_v52 }
 0xe7f   :  { %1408 = vmatpush3.bf16.msra.mxu0 %v1407_v48 }
 0xe81   :  { %v1456_v45 = vpop.eup %1455 }
 0xe82   :  { %v1058_v46 = vadd.f32 1.0, %v1456_v45 }
 0xe84   :  { %1457 = vrcp.f32 %v1058_v46 }
 0xe8e   :  { %v1458_v13 = vpop.eup %1457 }
 0xe8f   :  { %v1062_v50 = vmul.f32 %v1458_v13, %v1061_v47  ;;  %v1065_v63 = vsub.f32 1.0, %v1458_v13  ;;  %v1074_v58 = vmul.f32 %v1458_v13, %v1072_v56 }
 0xe91   :  { %v1063_v51 = vadd.f32 %v1062_v50, %v203_v49 }
 0xe93   :  { %1459 = vtanh.f32 %v1063_v51 }
 0xe9d   :  { %v1460_v35 = vpop.eup %1459 }
 0xe9e   :  { %1067 = vrot.lane.b32.xlu0 %v1460_v35, %s1464_s5 }
 0xf10   :  { %v1068_v57 = vpop.permute.xlu0 %1067 }
 0xf11   :  { %v1070_v9 = vmul.f32 %v1068_v57, %v1065_v63 }
 0xf13   :  { %v1075_v59 = vadd.f32 %v1074_v58, %v1070_v9 }
 0xf15   :  { %v1076_v0 = vsub.f32 %v1075_v59, %v1072_v56 }
 0xf17   :  { %1078 = vrot.lane.b32.xlu0 %v1076_v0, %s1464_s5 }
 0xf89   :  { %v1079_v4 = vpop.permute.xlu0 %1078 }
 0xf8a   :  { %v1081_v8 = vmul.f32 %v1219_v6, %v1079_v4 }
 0xf8c   :  { %v1082_v12 = vadd.f32 %v1081_v8, %v974_v37 }
 0xf8e   :  { %v1083_v14 = vmul.f32 %v1219_v6, %v1082_v12  ;;  %1251 = vmatmul.mubr.msk.f32.vlgmr.msra.gmra.mrb[22].mxu0 %vm67_vm0, %v1082_v12 }
 0xf90   :  { %1222 = vst.msk [vmem:[%s1938_s8 + $0x38] sm:$0xff] %vm67_vm0, %v1083_v14 }
0x1061   :  { %v1170_v15 = vpop.f32.mrb[22].mxu0 }
0x1062   :  { %v1171_v16 = vadd.f32 %v1223_v3, %v1170_v15  ;;  %v1252_v60 = vpop.f32.mrb[23].mxu0 }
0x1064   :  { %1461 = vtanh.f32 %v1171_v16 }
0x106e   :  { %v1462_v17 = vpop.eup %1461 }
0x106f   :  { %1176 = vst.msk [vmem:[%s1941_s9] sm:$0xff] %vm1175_vm2, %v1462_v17 }

</bundles_post_ra>
